<compile_context>
chip_gen: v5e
topology: v5e:2x2
jax: 0.10.0
libtpu: 0.0.40
codegen_flags: <defaults>
</compile_context>

<pallas_src>
import jax
import jax.numpy as jnp
from jax import lax
from jax.experimental import pallas as pl
from jax.experimental.pallas import tpu as pltpu

# ---- config (real t12_35M is L=12, D=480, H=20, I=1920, vocab=33; scaled down) ----
VOCAB = 33
HIDDEN = 32
N_HEADS = 4
HEAD_DIM = HIDDEN // N_HEADS
INTERMEDIATE = 64
N_LAYERS = 2
LN_EPS = 1e-5
MASK_RATIO_TRAIN = 0.15 * 0.8  # ESM2 token_dropout rescale (no <mask> tokens in input)


# ----------------------------- fused Pallas kernel -----------------------------
def _esm2_fused_kernel(x_ref, cos_ref, sin_ref, mask_ref,
                       ln1_g_ref, ln1_b_ref, w_qkv_ref, b_qkv_ref,
                       w_o_ref, b_o_ref, ln2_g_ref, ln2_b_ref,
                       w_fc1_ref, b_fc1_ref, w_fc2_ref, b_fc2_ref,
                       fin_g_ref, fin_b_ref, w_pool_ref, b_pool_ref,
                       out_ref):
    D = HIDDEN
    Dh = HEAD_DIM
    H = N_HEADS
    BS = x_ref.shape[0]          # B*S rows (batch folded into M)
    B = out_ref.shape[0]
    S = BS // B

    x = x_ref[...]               # (B*S, D) f32 — whole batch, flattened
    cosf = cos_ref[...]          # (B*S, D) rotary cos, tiled per head & batch
    sinf = sin_ref[...]          # (B*S, D) rotary sin
    neg_mask = mask_ref[...]     # (B*S, B*S) 0 within a sequence, -1e9 across sequences

    def layer_norm(v, g, b):
        mu = jnp.mean(v, axis=-1, keepdims=True)
        var = jnp.mean(jnp.square(v - mu), axis=-1, keepdims=True)
        return (v - mu) * lax.rsqrt(var + LN_EPS) * g + b

    def matmul(a, w, b):
        # bf16 MXU operands, f32 accumulation, fused bias add
        return jnp.dot(a.astype(jnp.bfloat16), w,
                       preferred_element_type=jnp.float32) + b

    for l in range(N_LAYERS):
        # ---------------- self-attention block (pre-LN) ----------------
        h0 = layer_norm(x, ln1_g_ref[l], ln1_b_ref[l])
        # fused [q | q@R | k | k@R | v] projection (q already scaled by Dh**-0.5)
        qkv = matmul(h0, w_qkv_ref[l], b_qkv_ref[l])                 # (B*S, 5D)
        # rotary embedding is purely elementwise (rotate_half folded into weights)
        # NOTE(synk): at D=32 these segment slices are sub-vreg no matter the layout;
        # at real D=480 pad each segment to 512 columns for lane-aligned slices.
        q = qkv[:, 0 * D:1 * D] * cosf + qkv[:, 1 * D:2 * D] * sinf  # (B*S, D)
        k = qkv[:, 2 * D:3 * D] * cosf + qkv[:, 3 * D:4 * D] * sinf  # (B*S, D)
        v = qkv[:, 4 * D:5 * D]                                      # (B*S, D)

        # Attention over the whole folded batch: block-diagonal mask keeps sequences
        # independent; per-head out-projection is accumulated (no ctx concatenate).
        # TODO(synk): assumes an all-ones attention mask (no padding).
        attn = jnp.zeros((BS, D), jnp.float32)
        for h in range(H):
            sl = slice(h * Dh, (h + 1) * Dh)
            q_h = q[:, sl].astype(jnp.bfloat16)                      # (B*S, Dh)
            k_h = k[:, sl].astype(jnp.bfloat16)
            v_h = v[:, sl].astype(jnp.bfloat16)
            # q k^T without an explicit transpose: contract last dims directly
            s = lax.dot_general(q_h, k_h, (((1,), (1,)), ((), ())),
                                preferred_element_type=jnp.float32)  # (B*S, B*S)
            s = s + neg_mask
            s = s - jnp.max(s, axis=-1, keepdims=True)
            p = jnp.exp(s)
            p = p * pl.reciprocal(jnp.sum(p, axis=-1, keepdims=True), approx=True)
            ctx_h = jnp.dot(p.astype(jnp.bfloat16), v_h,
                            preferred_element_type=jnp.float32)      # (B*S, Dh)
            # fold this head's slice of the output projection (ctx @ W_o)
            attn = attn + jnp.dot(ctx_h.astype(jnp.bfloat16), w_o_ref[l * H + h],
                                  preferred_element_type=jnp.float32)
        x = x + attn + b_o_ref[l]                                    # fused residual

        # ---------------- feed-forward block (pre-LN) ----------------
        h1 = layer_norm(x, ln2_g_ref[l], ln2_b_ref[l])
        h1 = matmul(h1, w_fc1_ref[l], b_fc1_ref[l])                  # (B*S, I)
        h1 = 0.5 * h1 * (1.0 + lax.erf(h1 * 0.7071067811865476))     # exact-erf GELU
        x = x + matmul(h1, w_fc2_ref[l], b_fc2_ref[l])               # fused residual

    # emb_layer_norm_after (final encoder LayerNorm)
    x = layer_norm(x, fin_g_ref[...], fin_b_ref[...])

    # EsmPooler: dense + tanh on each sequence's first (<cls>) token
    cls_tok = jnp.concatenate([x[b * S:b * S + 1, :] for b in range(B)], axis=0)  # (B, D)
    out_ref[...] = jnp.tanh(matmul(cls_tok, w_pool_ref[...], b_pool_ref[...]))


# ------------------------------- parameters ------------------------------------
def init_params(key):
    def dense(k, fan_in, fan_out):
        kw, kb = jax.random.split(k)
        w = 0.02 * jax.random.normal(kw, (fan_in, fan_out), jnp.float32)
        b = 0.02 * jax.random.normal(kb, (fan_out,), jnp.float32)
        return (w, b)

    keys = jax.random.split(key, 2 + N_LAYERS)
    emb = 0.02 * jax.random.normal(keys[0], (VOCAB, HIDDEN), jnp.float32)
    emb = emb.at[1].set(0.0)  # padding_idx=1 row zeroed, as in nn.Embedding
    layers = []
    for l in range(N_LAYERS):
        lk = jax.random.split(keys[1 + l], 6)
        layers.append(dict(
            attn_ln_g=jnp.ones((HIDDEN,), jnp.float32),
            attn_ln_b=jnp.zeros((HIDDEN,), jnp.float32),
            q=dense(lk[0], HIDDEN, HIDDEN),
            k=dense(lk[1], HIDDEN, HIDDEN),
            v=dense(lk[2], HIDDEN, HIDDEN),
            o=dense(lk[3], HIDDEN, HIDDEN),
            ffn_ln_g=jnp.ones((HIDDEN,), jnp.float32),
            ffn_ln_b=jnp.zeros((HIDDEN,), jnp.float32),
            fc1=dense(lk[4], HIDDEN, INTERMEDIATE),
            fc2=dense(lk[5], INTERMEDIATE, HIDDEN),
        ))
    return dict(
        emb=emb,
        layers=layers,
        final_ln_g=jnp.ones((HIDDEN,), jnp.float32),
        final_ln_b=jnp.zeros((HIDDEN,), jnp.float32),
        pooler=dense(keys[1 + N_LAYERS], HIDDEN, HIDDEN),
    )


def pack_params(params, seq_len):
    """One-time weight packing: fuse QKV(+rotary rotate_half)+q-scale, stack layers,
    split the output projection per head, cast matmul weights to bf16, pre-scale the
    embedding table and precompute the rotary trig tables (seq_len is static)."""
    D, Dh, half = HIDDEN, HEAD_DIM, HEAD_DIM // 2
    # rotate_half(x) == x @ R (sign baked into R); block-diagonal over heads.
    R = jnp.zeros((Dh, Dh), jnp.float32)
    R = R.at[jnp.arange(half) + half, jnp.arange(half)].set(-1.0)
    R = R.at[jnp.arange(half), jnp.arange(half) + half].set(1.0)
    Rf = jnp.kron(jnp.eye(N_HEADS, dtype=jnp.float32), R)          # (D, D)

    scale = HEAD_DIM ** -0.5
    w_qkv, b_qkv, w_o, b_o = [], [], [], []
    ln1_g, ln1_b, ln2_g, ln2_b = [], [], [], []
    w_fc1, b_fc1, w_fc2, b_fc2 = [], [], [], []
    for layer in params["layers"]:
        wq, bq = layer["q"]
        wk, bk = layer["k"]
        wv, bv = layer["v"]
        wq, bq = wq * scale, bq * scale                             # fold q-scale
        w_qkv.append(jnp.concatenate([wq, wq @ Rf, wk, wk @ Rf, wv], axis=1))
        b_qkv.append(jnp.concatenate([bq, bq @ Rf, bk, bk @ Rf, bv], axis=0))
        wo, bo = layer["o"]
        w_o.append(wo.reshape(N_HEADS, Dh, D))                      # per-head split
        b_o.append(bo)
        ln1_g.append(layer["attn_ln_g"]), ln1_b.append(layer["attn_ln_b"])
        ln2_g.append(layer["ffn_ln_g"]), ln2_b.append(layer["ffn_ln_b"])
        w1, b1 = layer["fc1"]
        w2, b2 = layer["fc2"]
        w_fc1.append(w1), b_fc1.append(b1), w_fc2.append(w2), b_fc2.append(b2)

    stk = lambda xs: jnp.stack(xs)
    vec = lambda xs: jnp.stack(xs)[:, None, :]                      # (L, 1, N)
    wp, bp = params["pooler"]

    # Rotary trig tables precomputed once (identical across layers/forwards).
    inv_freq = 1.0 / (10000.0 ** (jnp.arange(0, Dh, 2, dtype=jnp.float32) / Dh))
    t = jnp.arange(seq_len, dtype=jnp.float32)
    freqs = t[:, None] * inv_freq[None, :]
    ang = jnp.concatenate([freqs, freqs], axis=-1)                  # (S, Dh)
    cosf = jnp.tile(jnp.cos(ang), (1, N_HEADS))                     # (S, D)
    sinf = jnp.tile(jnp.sin(ang), (1, N_HEADS))                     # (S, D)

    return dict(
        emb=params["emb"] * (1.0 - MASK_RATIO_TRAIN),               # token_dropout rescale
        cos=cosf, sin=sinf,
        ln1_g=vec(ln1_g), ln1_b=vec(ln1_b),
        w_qkv=stk(w_qkv).astype(jnp.bfloat16), b_qkv=vec(b_qkv),
        w_o=stk(w_o).reshape(N_LAYERS * N_HEADS, Dh, D).astype(jnp.bfloat16),
        b_o=vec(b_o),
        ln2_g=vec(ln2_g), ln2_b=vec(ln2_b),
        w_fc1=stk(w_fc1).astype(jnp.bfloat16), b_fc1=vec(b_fc1),
        w_fc2=stk(w_fc2).astype(jnp.bfloat16), b_fc2=vec(b_fc2),
        fin_g=params["final_ln_g"].reshape(1, D),
        fin_b=params["final_ln_b"].reshape(1, D),
        w_pool=wp.astype(jnp.bfloat16), b_pool=bp.reshape(1, D),
    )


# ------------------------------- forward ---------------------------------------
def my_model_forward(packed, input_ids):
    """Equivalent of MyModel.forward: returns esm2(input_ids).pooler_output."""
    B, S = input_ids.shape
    D = HIDDEN
    assert packed["cos"].shape[0] == S, "rotary tables packed for a different seq_len"

    # EsmEmbeddings: word embeddings (table pre-scaled for token_dropout; attention
    # mask assumed all-ones, no <mask> tokens present).  Batch is folded into M.
    x = jnp.take(packed["emb"], input_ids, axis=0).reshape(B * S, D)   # (B*S, D)

    # Tile the precomputed rotary tables over the batch; build the block-diagonal
    # additive mask that keeps sequences independent inside the folded attention.
    cosf = jnp.tile(packed["cos"], (B, 1))                             # (B*S, D)
    sinf = jnp.tile(packed["sin"], (B, 1))
    bid = jnp.arange(B * S, dtype=jnp.int32) // S
    neg_mask = jnp.where(bid[:, None] == bid[None, :], 0.0, -1e9).astype(jnp.float32)

    out = pl.pallas_call(
        _esm2_fused_kernel,
        out_shape=jax.ShapeDtypeStruct((B, D), jnp.float32),
        # No grid: one invocation over the whole (tiny) problem — no per-step
        # overhead and no double-buffering of the constant weight blocks.
        # TODO(synk): at real ESM2-35M size, switch to a layer grid axis
        # ("arbitrary") streaming one layer's weights per step.
        compiler_params=pltpu.CompilerParams(
            vmem_limit_bytes=32 * 1024 * 1024),   # headroom vs v5e's 16 MiB default
    )(x, cosf, sinf, neg_mask,
      packed["ln1_g"], packed["ln1_b"], packed["w_qkv"], packed["b_qkv"],
      packed["w_o"], packed["b_o"], packed["ln2_g"], packed["ln2_b"],
      packed["w_fc1"], packed["b_fc1"], packed["w_fc2"], packed["b_fc2"],
      packed["fin_g"], packed["fin_b"], packed["w_pool"], packed["b_pool"])

    # TODO(synk): the PyTorch forward also does `print(self.esm2(input_ids))`; debug
    # print of the full model output is omitted here.
    return out                                                      # (B, D) pooler_output


if __name__ == "__main__":
    key = jax.random.PRNGKey(0)
    pkey, ikey = jax.random.split(key)

    B, S = 2, 8
    params = init_params(pkey)
    packed = pack_params(params, seq_len=S)   # one-time weight fusion/packing

    input_ids = jax.random.randint(ikey, (B, S), 4, 24, dtype=jnp.int32)
    input_ids = input_ids.at[:, 0].set(0)   # <cls>
    input_ids = input_ids.at[:, -1].set(2)  # <eos>

    pooled = jax.jit(my_model_forward)(packed, input_ids)
    pooled = jax.block_until_ready(pooled)
    assert pooled.shape == (B, HIDDEN) and pooled.dtype == jnp.float32
    assert bool(jnp.all(jnp.isfinite(pooled)))
    print("KERNEL_OK")
</pallas_src>

<mosaic_0001>
module attributes {stable_mosaic.version = 11 : i64} {
  func.func @_esm2_fused_kernel(%arg0: memref<16x32xf32, #tpu.memory_space<vmem>>, %arg1: memref<16x32xf32, #tpu.memory_space<vmem>>, %arg2: memref<16x32xf32, #tpu.memory_space<vmem>>, %arg3: memref<16x16xf32, #tpu.memory_space<vmem>>, %arg4: memref<2x1x32xf32, #tpu.memory_space<vmem>>, %arg5: memref<2x1x32xf32, #tpu.memory_space<vmem>>, %arg6: memref<2x32x160xbf16, #tpu.memory_space<vmem>>, %arg7: memref<2x1x160xf32, #tpu.memory_space<vmem>>, %arg8: memref<8x8x32xbf16, #tpu.memory_space<vmem>>, %arg9: memref<2x1x32xf32, #tpu.memory_space<vmem>>, %arg10: memref<2x1x32xf32, #tpu.memory_space<vmem>>, %arg11: memref<2x1x32xf32, #tpu.memory_space<vmem>>, %arg12: memref<2x32x64xbf16, #tpu.memory_space<vmem>>, %arg13: memref<2x1x64xf32, #tpu.memory_space<vmem>>, %arg14: memref<2x64x32xbf16, #tpu.memory_space<vmem>>, %arg15: memref<2x1x32xf32, #tpu.memory_space<vmem>>, %arg16: memref<1x32xf32, #tpu.memory_space<vmem>>, %arg17: memref<1x32xf32, #tpu.memory_space<vmem>>, %arg18: memref<32x32xbf16, #tpu.memory_space<vmem>>, %arg19: memref<1x32xf32, #tpu.memory_space<vmem>>, %arg20: memref<2x32xf32, #tpu.memory_space<vmem>>) attributes {dimension_semantics = [], scalar_prefetch = 0 : i64, scratch_operands = 0 : i64, tpu.core_type = #tpu.core_type<tc>} {
    %c0 = arith.constant 0 : index
    %c0_0 = arith.constant 0 : index
    %0 = vector.load %arg0[%c0, %c0_0] : memref<16x32xf32, #tpu.memory_space<vmem>>, vector<16x32xf32>
    %c0_1 = arith.constant 0 : index
    %c0_2 = arith.constant 0 : index
    %1 = vector.load %arg1[%c0_1, %c0_2] : memref<16x32xf32, #tpu.memory_space<vmem>>, vector<16x32xf32>
    %c0_3 = arith.constant 0 : index
    %c0_4 = arith.constant 0 : index
    %2 = vector.load %arg2[%c0_3, %c0_4] : memref<16x32xf32, #tpu.memory_space<vmem>>, vector<16x32xf32>
    %c0_5 = arith.constant 0 : index
    %c0_6 = arith.constant 0 : index
    %3 = vector.load %arg3[%c0_5, %c0_6] : memref<16x16xf32, #tpu.memory_space<vmem>>, vector<16x16xf32>
    %c0_7 = arith.constant 0 : index
    %c0_8 = arith.constant 0 : index
    %c0_9 = arith.constant 0 : index
    %4 = vector.load %arg4[%c0_7, %c0_8, %c0_9] : memref<2x1x32xf32, #tpu.memory_space<vmem>>, vector<1x1x32xf32>
    %5 = vector.shape_cast %4 : vector<1x1x32xf32> to vector<1x32xf32>
    %c0_10 = arith.constant 0 : index
    %c0_11 = arith.constant 0 : index
    %c0_12 = arith.constant 0 : index
    %6 = vector.load %arg5[%c0_10, %c0_11, %c0_12] : memref<2x1x32xf32, #tpu.memory_space<vmem>>, vector<1x1x32xf32>
    %7 = vector.shape_cast %6 : vector<1x1x32xf32> to vector<1x32xf32>
    %cst = arith.constant dense<0.000000e+00> : vector<16xf32>
    %8 = vector.multi_reduction <add>, %0, %cst [1] : vector<16x32xf32> to vector<16xf32>
    %9 = vector.shape_cast %8 : vector<16xf32> to vector<16x1xf32>
    %cst_13 = arith.constant 3.200000e+01 : f32
    %10 = vector.broadcast %cst_13 : f32 to vector<16x1xf32>
    %11 = arith.divf %9, %10 : vector<16x1xf32>
    %12 = vector.broadcast %11 : vector<16x1xf32> to vector<16x32xf32>
    %13 = arith.subf %0, %12 : vector<16x32xf32>
    %14 = arith.mulf %13, %13 : vector<16x32xf32>
    %cst_14 = arith.constant dense<0.000000e+00> : vector<16xf32>
    %15 = vector.multi_reduction <add>, %14, %cst_14 [1] : vector<16x32xf32> to vector<16xf32>
    %16 = vector.shape_cast %15 : vector<16xf32> to vector<16x1xf32>
    %cst_15 = arith.constant 3.200000e+01 : f32
    %17 = vector.broadcast %cst_15 : f32 to vector<16x1xf32>
    %18 = arith.divf %16, %17 : vector<16x1xf32>
    %19 = vector.broadcast %11 : vector<16x1xf32> to vector<16x32xf32>
    %20 = arith.subf %0, %19 : vector<16x32xf32>
    %cst_16 = arith.constant 9.99999974E-6 : f32
    %21 = vector.broadcast %cst_16 : f32 to vector<16x1xf32>
    %22 = arith.addf %18, %21 : vector<16x1xf32>
    %23 = math.rsqrt %22 : vector<16x1xf32>
    %24 = vector.broadcast %23 : vector<16x1xf32> to vector<16x32xf32>
    %25 = arith.mulf %20, %24 : vector<16x32xf32>
    %26 = vector.broadcast %5 : vector<1x32xf32> to vector<16x32xf32>
    %27 = arith.mulf %25, %26 : vector<16x32xf32>
    %28 = vector.broadcast %7 : vector<1x32xf32> to vector<16x32xf32>
    %29 = arith.addf %27, %28 : vector<16x32xf32>
    %c0_17 = arith.constant 0 : index
    %c0_18 = arith.constant 0 : index
    %c0_19 = arith.constant 0 : index
    %30 = vector.load %arg6[%c0_17, %c0_18, %c0_19] : memref<2x32x160xbf16, #tpu.memory_space<vmem>>, vector<1x32x160xbf16>
    %31 = vector.shape_cast %30 : vector<1x32x160xbf16> to vector<32x160xbf16>
    %c0_20 = arith.constant 0 : index
    %c0_21 = arith.constant 0 : index
    %c0_22 = arith.constant 0 : index
    %32 = vector.load %arg7[%c0_20, %c0_21, %c0_22] : memref<2x1x160xf32, #tpu.memory_space<vmem>>, vector<1x1x160xf32>
    %33 = vector.shape_cast %32 : vector<1x1x160xf32> to vector<1x160xf32>
    %34 = arith.truncf %29 : vector<16x32xf32> to vector<16x32xbf16>
    %cst_23 = arith.constant dense<0.000000e+00> : vector<16x160xf32>
    %35 = tpu.matmul %34, %31, %cst_23 {dimension_numbers = #tpu.dot_dimension_numbers<[1], [0], [0], [1], [0, 0, 1, 1], [], []>} : vector<16x32xbf16>, vector<32x160xbf16>, vector<16x160xf32> -> vector<16x160xf32>
    %36 = vector.broadcast %33 : vector<1x160xf32> to vector<16x160xf32>
    %37 = arith.addf %35, %36 : vector<16x160xf32>
    %38 = vector.extract_strided_slice %37 {offsets = [0, 0], sizes = [16, 32], strides = [1, 1]} : vector<16x160xf32> to vector<16x32xf32>
    %39 = arith.mulf %38, %1 : vector<16x32xf32>
    %40 = vector.extract_strided_slice %37 {offsets = [0, 32], sizes = [16, 32], strides = [1, 1]} : vector<16x160xf32> to vector<16x32xf32>
    %41 = arith.mulf %40, %2 : vector<16x32xf32>
    %42 = arith.addf %39, %41 : vector<16x32xf32>
    %43 = vector.extract_strided_slice %37 {offsets = [0, 64], sizes = [16, 32], strides = [1, 1]} : vector<16x160xf32> to vector<16x32xf32>
    %44 = arith.mulf %43, %1 : vector<16x32xf32>
    %45 = vector.extract_strided_slice %37 {offsets = [0, 96], sizes = [16, 32], strides = [1, 1]} : vector<16x160xf32> to vector<16x32xf32>
    %46 = arith.mulf %45, %2 : vector<16x32xf32>
    %47 = arith.addf %44, %46 : vector<16x32xf32>
    %48 = vector.extract_strided_slice %37 {offsets = [0, 128], sizes = [16, 32], strides = [1, 1]} : vector<16x160xf32> to vector<16x32xf32>
    %cst_24 = arith.constant 0.000000e+00 : f32
    %49 = vector.broadcast %cst_24 : f32 to vector<16x32xf32>
    %50 = vector.extract_strided_slice %42 {offsets = [0, 0], sizes = [16, 8], strides = [1, 1]} : vector<16x32xf32> to vector<16x8xf32>
    %51 = arith.truncf %50 : vector<16x8xf32> to vector<16x8xbf16>
    %52 = vector.extract_strided_slice %47 {offsets = [0, 0], sizes = [16, 8], strides = [1, 1]} : vector<16x32xf32> to vector<16x8xf32>
    %53 = arith.truncf %52 : vector<16x8xf32> to vector<16x8xbf16>
    %54 = vector.extract_strided_slice %48 {offsets = [0, 0], sizes = [16, 8], strides = [1, 1]} : vector<16x32xf32> to vector<16x8xf32>
    %55 = arith.truncf %54 : vector<16x8xf32> to vector<16x8xbf16>
    %cst_25 = arith.constant dense<0.000000e+00> : vector<16x16xf32>
    %56 = tpu.matmul %51, %53, %cst_25 {dimension_numbers = #tpu.dot_dimension_numbers<[1], [1], [0], [0], [0, 0, 1, 0], [], []>} : vector<16x8xbf16>, vector<16x8xbf16>, vector<16x16xf32> -> vector<16x16xf32>
    %57 = arith.addf %56, %3 : vector<16x16xf32>
    %cst_26 = arith.constant dense<0xFF800000> : vector<16xf32>
    %58 = vector.multi_reduction <maximumf>, %57, %cst_26 [1] : vector<16x16xf32> to vector<16xf32>
    %59 = vector.shape_cast %58 : vector<16xf32> to vector<16x1xf32>
    %60 = vector.broadcast %59 : vector<16x1xf32> to vector<16x16xf32>
    %61 = arith.subf %57, %60 : vector<16x16xf32>
    %62 = math.exp %61 : vector<16x16xf32>
    %cst_27 = arith.constant dense<0.000000e+00> : vector<16xf32>
    %63 = vector.multi_reduction <add>, %62, %cst_27 [1] : vector<16x16xf32> to vector<16xf32>
    %64 = vector.shape_cast %63 : vector<16xf32> to vector<16x1xf32>
    %65 = tpu.reciprocal %64 {approx = true} : vector<16x1xf32> -> vector<16x1xf32>
    %66 = vector.broadcast %65 : vector<16x1xf32> to vector<16x16xf32>
    %67 = arith.mulf %62, %66 : vector<16x16xf32>
    %68 = arith.truncf %67 : vector<16x16xf32> to vector<16x16xbf16>
    %cst_28 = arith.constant dense<0.000000e+00> : vector<16x8xf32>
    %69 = tpu.matmul %68, %55, %cst_28 {dimension_numbers = #tpu.dot_dimension_numbers<[1], [0], [0], [1], [0, 0, 1, 1], [], []>} : vector<16x16xbf16>, vector<16x8xbf16>, vector<16x8xf32> -> vector<16x8xf32>
    %70 = arith.truncf %69 : vector<16x8xf32> to vector<16x8xbf16>
    %c0_29 = arith.constant 0 : index
    %c0_30 = arith.constant 0 : index
    %c0_31 = arith.constant 0 : index
    %71 = vector.load %arg8[%c0_29, %c0_30, %c0_31] : memref<8x8x32xbf16, #tpu.memory_space<vmem>>, vector<1x8x32xbf16>
    %72 = vector.shape_cast %71 : vector<1x8x32xbf16> to vector<8x32xbf16>
    %cst_32 = arith.constant dense<0.000000e+00> : vector<16x32xf32>
    %73 = tpu.matmul %70, %72, %cst_32 {dimension_numbers = #tpu.dot_dimension_numbers<[1], [0], [0], [1], [0, 0, 1, 1], [], []>} : vector<16x8xbf16>, vector<8x32xbf16>, vector<16x32xf32> -> vector<16x32xf32>
    %74 = arith.addf %49, %73 : vector<16x32xf32>
    %75 = vector.extract_strided_slice %42 {offsets = [0, 8], sizes = [16, 8], strides = [1, 1]} : vector<16x32xf32> to vector<16x8xf32>
    %76 = arith.truncf %75 : vector<16x8xf32> to vector<16x8xbf16>
    %77 = vector.extract_strided_slice %47 {offsets = [0, 8], sizes = [16, 8], strides = [1, 1]} : vector<16x32xf32> to vector<16x8xf32>
    %78 = arith.truncf %77 : vector<16x8xf32> to vector<16x8xbf16>
    %79 = vector.extract_strided_slice %48 {offsets = [0, 8], sizes = [16, 8], strides = [1, 1]} : vector<16x32xf32> to vector<16x8xf32>
    %80 = arith.truncf %79 : vector<16x8xf32> to vector<16x8xbf16>
    %cst_33 = arith.constant dense<0.000000e+00> : vector<16x16xf32>
    %81 = tpu.matmul %76, %78, %cst_33 {dimension_numbers = #tpu.dot_dimension_numbers<[1], [1], [0], [0], [0, 0, 1, 0], [], []>} : vector<16x8xbf16>, vector<16x8xbf16>, vector<16x16xf32> -> vector<16x16xf32>
    %82 = arith.addf %81, %3 : vector<16x16xf32>
    %cst_34 = arith.constant dense<0xFF800000> : vector<16xf32>
    %83 = vector.multi_reduction <maximumf>, %82, %cst_34 [1] : vector<16x16xf32> to vector<16xf32>
    %84 = vector.shape_cast %83 : vector<16xf32> to vector<16x1xf32>
    %85 = vector.broadcast %84 : vector<16x1xf32> to vector<16x16xf32>
    %86 = arith.subf %82, %85 : vector<16x16xf32>
    %87 = math.exp %86 : vector<16x16xf32>
    %cst_35 = arith.constant dense<0.000000e+00> : vector<16xf32>
    %88 = vector.multi_reduction <add>, %87, %cst_35 [1] : vector<16x16xf32> to vector<16xf32>
    %89 = vector.shape_cast %88 : vector<16xf32> to vector<16x1xf32>
    %90 = tpu.reciprocal %89 {approx = true} : vector<16x1xf32> -> vector<16x1xf32>
    %91 = vector.broadcast %90 : vector<16x1xf32> to vector<16x16xf32>
    %92 = arith.mulf %87, %91 : vector<16x16xf32>
    %93 = arith.truncf %92 : vector<16x16xf32> to vector<16x16xbf16>
    %cst_36 = arith.constant dense<0.000000e+00> : vector<16x8xf32>
    %94 = tpu.matmul %93, %80, %cst_36 {dimension_numbers = #tpu.dot_dimension_numbers<[1], [0], [0], [1], [0, 0, 1, 1], [], []>} : vector<16x16xbf16>, vector<16x8xbf16>, vector<16x8xf32> -> vector<16x8xf32>
    %95 = arith.truncf %94 : vector<16x8xf32> to vector<16x8xbf16>
    %c1 = arith.constant 1 : index
    %c0_37 = arith.constant 0 : index
    %c0_38 = arith.constant 0 : index
    %96 = vector.load %arg8[%c1, %c0_37, %c0_38] : memref<8x8x32xbf16, #tpu.memory_space<vmem>>, vector<1x8x32xbf16>
    %97 = vector.shape_cast %96 : vector<1x8x32xbf16> to vector<8x32xbf16>
    %cst_39 = arith.constant dense<0.000000e+00> : vector<16x32xf32>
    %98 = tpu.matmul %95, %97, %cst_39 {dimension_numbers = #tpu.dot_dimension_numbers<[1], [0], [0], [1], [0, 0, 1, 1], [], []>} : vector<16x8xbf16>, vector<8x32xbf16>, vector<16x32xf32> -> vector<16x32xf32>
    %99 = arith.addf %74, %98 : vector<16x32xf32>
    %100 = vector.extract_strided_slice %42 {offsets = [0, 16], sizes = [16, 8], strides = [1, 1]} : vector<16x32xf32> to vector<16x8xf32>
    %101 = arith.truncf %100 : vector<16x8xf32> to vector<16x8xbf16>
    %102 = vector.extract_strided_slice %47 {offsets = [0, 16], sizes = [16, 8], strides = [1, 1]} : vector<16x32xf32> to vector<16x8xf32>
    %103 = arith.truncf %102 : vector<16x8xf32> to vector<16x8xbf16>
    %104 = vector.extract_strided_slice %48 {offsets = [0, 16], sizes = [16, 8], strides = [1, 1]} : vector<16x32xf32> to vector<16x8xf32>
    %105 = arith.truncf %104 : vector<16x8xf32> to vector<16x8xbf16>
    %cst_40 = arith.constant dense<0.000000e+00> : vector<16x16xf32>
    %106 = tpu.matmul %101, %103, %cst_40 {dimension_numbers = #tpu.dot_dimension_numbers<[1], [1], [0], [0], [0, 0, 1, 0], [], []>} : vector<16x8xbf16>, vector<16x8xbf16>, vector<16x16xf32> -> vector<16x16xf32>
    %107 = arith.addf %106, %3 : vector<16x16xf32>
    %cst_41 = arith.constant dense<0xFF800000> : vector<16xf32>
    %108 = vector.multi_reduction <maximumf>, %107, %cst_41 [1] : vector<16x16xf32> to vector<16xf32>
    %109 = vector.shape_cast %108 : vector<16xf32> to vector<16x1xf32>
    %110 = vector.broadcast %109 : vector<16x1xf32> to vector<16x16xf32>
    %111 = arith.subf %107, %110 : vector<16x16xf32>
    %112 = math.exp %111 : vector<16x16xf32>
    %cst_42 = arith.constant dense<0.000000e+00> : vector<16xf32>
    %113 = vector.multi_reduction <add>, %112, %cst_42 [1] : vector<16x16xf32> to vector<16xf32>
    %114 = vector.shape_cast %113 : vector<16xf32> to vector<16x1xf32>
    %115 = tpu.reciprocal %114 {approx = true} : vector<16x1xf32> -> vector<16x1xf32>
    %116 = vector.broadcast %115 : vector<16x1xf32> to vector<16x16xf32>
    %117 = arith.mulf %112, %116 : vector<16x16xf32>
    %118 = arith.truncf %117 : vector<16x16xf32> to vector<16x16xbf16>
    %cst_43 = arith.constant dense<0.000000e+00> : vector<16x8xf32>
    %119 = tpu.matmul %118, %105, %cst_43 {dimension_numbers = #tpu.dot_dimension_numbers<[1], [0], [0], [1], [0, 0, 1, 1], [], []>} : vector<16x16xbf16>, vector<16x8xbf16>, vector<16x8xf32> -> vector<16x8xf32>
    %120 = arith.truncf %119 : vector<16x8xf32> to vector<16x8xbf16>
    %c2 = arith.constant 2 : index
    %c0_44 = arith.constant 0 : index
    %c0_45 = arith.constant 0 : index
    %121 = vector.load %arg8[%c2, %c0_44, %c0_45] : memref<8x8x32xbf16, #tpu.memory_space<vmem>>, vector<1x8x32xbf16>
    %122 = vector.shape_cast %121 : vector<1x8x32xbf16> to vector<8x32xbf16>
    %cst_46 = arith.constant dense<0.000000e+00> : vector<16x32xf32>
    %123 = tpu.matmul %120, %122, %cst_46 {dimension_numbers = #tpu.dot_dimension_numbers<[1], [0], [0], [1], [0, 0, 1, 1], [], []>} : vector<16x8xbf16>, vector<8x32xbf16>, vector<16x32xf32> -> vector<16x32xf32>
    %124 = arith.addf %99, %123 : vector<16x32xf32>
    %125 = vector.extract_strided_slice %42 {offsets = [0, 24], sizes = [16, 8], strides = [1, 1]} : vector<16x32xf32> to vector<16x8xf32>
    %126 = arith.truncf %125 : vector<16x8xf32> to vector<16x8xbf16>
    %127 = vector.extract_strided_slice %47 {offsets = [0, 24], sizes = [16, 8], strides = [1, 1]} : vector<16x32xf32> to vector<16x8xf32>
    %128 = arith.truncf %127 : vector<16x8xf32> to vector<16x8xbf16>
    %129 = vector.extract_strided_slice %48 {offsets = [0, 24], sizes = [16, 8], strides = [1, 1]} : vector<16x32xf32> to vector<16x8xf32>
    %130 = arith.truncf %129 : vector<16x8xf32> to vector<16x8xbf16>
    %cst_47 = arith.constant dense<0.000000e+00> : vector<16x16xf32>
    %131 = tpu.matmul %126, %128, %cst_47 {dimension_numbers = #tpu.dot_dimension_numbers<[1], [1], [0], [0], [0, 0, 1, 0], [], []>} : vector<16x8xbf16>, vector<16x8xbf16>, vector<16x16xf32> -> vector<16x16xf32>
    %132 = arith.addf %131, %3 : vector<16x16xf32>
    %cst_48 = arith.constant dense<0xFF800000> : vector<16xf32>
    %133 = vector.multi_reduction <maximumf>, %132, %cst_48 [1] : vector<16x16xf32> to vector<16xf32>
    %134 = vector.shape_cast %133 : vector<16xf32> to vector<16x1xf32>
    %135 = vector.broadcast %134 : vector<16x1xf32> to vector<16x16xf32>
    %136 = arith.subf %132, %135 : vector<16x16xf32>
    %137 = math.exp %136 : vector<16x16xf32>
    %cst_49 = arith.constant dense<0.000000e+00> : vector<16xf32>
    %138 = vector.multi_reduction <add>, %137, %cst_49 [1] : vector<16x16xf32> to vector<16xf32>
    %139 = vector.shape_cast %138 : vector<16xf32> to vector<16x1xf32>
    %140 = tpu.reciprocal %139 {approx = true} : vector<16x1xf32> -> vector<16x1xf32>
    %141 = vector.broadcast %140 : vector<16x1xf32> to vector<16x16xf32>
    %142 = arith.mulf %137, %141 : vector<16x16xf32>
    %143 = arith.truncf %142 : vector<16x16xf32> to vector<16x16xbf16>
    %cst_50 = arith.constant dense<0.000000e+00> : vector<16x8xf32>
    %144 = tpu.matmul %143, %130, %cst_50 {dimension_numbers = #tpu.dot_dimension_numbers<[1], [0], [0], [1], [0, 0, 1, 1], [], []>} : vector<16x16xbf16>, vector<16x8xbf16>, vector<16x8xf32> -> vector<16x8xf32>
    %145 = arith.truncf %144 : vector<16x8xf32> to vector<16x8xbf16>
    %c3 = arith.constant 3 : index
    %c0_51 = arith.constant 0 : index
    %c0_52 = arith.constant 0 : index
    %146 = vector.load %arg8[%c3, %c0_51, %c0_52] : memref<8x8x32xbf16, #tpu.memory_space<vmem>>, vector<1x8x32xbf16>
    %147 = vector.shape_cast %146 : vector<1x8x32xbf16> to vector<8x32xbf16>
    %cst_53 = arith.constant dense<0.000000e+00> : vector<16x32xf32>
    %148 = tpu.matmul %145, %147, %cst_53 {dimension_numbers = #tpu.dot_dimension_numbers<[1], [0], [0], [1], [0, 0, 1, 1], [], []>} : vector<16x8xbf16>, vector<8x32xbf16>, vector<16x32xf32> -> vector<16x32xf32>
    %149 = arith.addf %124, %148 : vector<16x32xf32>
    %150 = arith.addf %0, %149 : vector<16x32xf32>
    %c0_54 = arith.constant 0 : index
    %c0_55 = arith.constant 0 : index
    %c0_56 = arith.constant 0 : index
    %151 = vector.load %arg9[%c0_54, %c0_55, %c0_56] : memref<2x1x32xf32, #tpu.memory_space<vmem>>, vector<1x1x32xf32>
    %152 = vector.shape_cast %151 : vector<1x1x32xf32> to vector<1x32xf32>
    %153 = vector.broadcast %152 : vector<1x32xf32> to vector<16x32xf32>
    %154 = arith.addf %150, %153 : vector<16x32xf32>
    %c0_57 = arith.constant 0 : index
    %c0_58 = arith.constant 0 : index
    %c0_59 = arith.constant 0 : index
    %155 = vector.load %arg10[%c0_57, %c0_58, %c0_59] : memref<2x1x32xf32, #tpu.memory_space<vmem>>, vector<1x1x32xf32>
    %156 = vector.shape_cast %155 : vector<1x1x32xf32> to vector<1x32xf32>
    %c0_60 = arith.constant 0 : index
    %c0_61 = arith.constant 0 : index
    %c0_62 = arith.constant 0 : index
    %157 = vector.load %arg11[%c0_60, %c0_61, %c0_62] : memref<2x1x32xf32, #tpu.memory_space<vmem>>, vector<1x1x32xf32>
    %158 = vector.shape_cast %157 : vector<1x1x32xf32> to vector<1x32xf32>
    %cst_63 = arith.constant dense<0.000000e+00> : vector<16xf32>
    %159 = vector.multi_reduction <add>, %154, %cst_63 [1] : vector<16x32xf32> to vector<16xf32>
    %160 = vector.shape_cast %159 : vector<16xf32> to vector<16x1xf32>
    %cst_64 = arith.constant 3.200000e+01 : f32
    %161 = vector.broadcast %cst_64 : f32 to vector<16x1xf32>
    %162 = arith.divf %160, %161 : vector<16x1xf32>
    %163 = vector.broadcast %162 : vector<16x1xf32> to vector<16x32xf32>
    %164 = arith.subf %154, %163 : vector<16x32xf32>
    %165 = arith.mulf %164, %164 : vector<16x32xf32>
    %cst_65 = arith.constant dense<0.000000e+00> : vector<16xf32>
    %166 = vector.multi_reduction <add>, %165, %cst_65 [1] : vector<16x32xf32> to vector<16xf32>
    %167 = vector.shape_cast %166 : vector<16xf32> to vector<16x1xf32>
    %cst_66 = arith.constant 3.200000e+01 : f32
    %168 = vector.broadcast %cst_66 : f32 to vector<16x1xf32>
    %169 = arith.divf %167, %168 : vector<16x1xf32>
    %170 = vector.broadcast %162 : vector<16x1xf32> to vector<16x32xf32>
    %171 = arith.subf %154, %170 : vector<16x32xf32>
    %cst_67 = arith.constant 9.99999974E-6 : f32
    %172 = vector.broadcast %cst_67 : f32 to vector<16x1xf32>
    %173 = arith.addf %169, %172 : vector<16x1xf32>
    %174 = math.rsqrt %173 : vector<16x1xf32>
    %175 = vector.broadcast %174 : vector<16x1xf32> to vector<16x32xf32>
    %176 = arith.mulf %171, %175 : vector<16x32xf32>
    %177 = vector.broadcast %156 : vector<1x32xf32> to vector<16x32xf32>
    %178 = arith.mulf %176, %177 : vector<16x32xf32>
    %179 = vector.broadcast %158 : vector<1x32xf32> to vector<16x32xf32>
    %180 = arith.addf %178, %179 : vector<16x32xf32>
    %c0_68 = arith.constant 0 : index
    %c0_69 = arith.constant 0 : index
    %c0_70 = arith.constant 0 : index
    %181 = vector.load %arg12[%c0_68, %c0_69, %c0_70] : memref<2x32x64xbf16, #tpu.memory_space<vmem>>, vector<1x32x64xbf16>
    %182 = vector.shape_cast %181 : vector<1x32x64xbf16> to vector<32x64xbf16>
    %c0_71 = arith.constant 0 : index
    %c0_72 = arith.constant 0 : index
    %c0_73 = arith.constant 0 : index
    %183 = vector.load %arg13[%c0_71, %c0_72, %c0_73] : memref<2x1x64xf32, #tpu.memory_space<vmem>>, vector<1x1x64xf32>
    %184 = vector.shape_cast %183 : vector<1x1x64xf32> to vector<1x64xf32>
    %185 = arith.truncf %180 : vector<16x32xf32> to vector<16x32xbf16>
    %cst_74 = arith.constant dense<0.000000e+00> : vector<16x64xf32>
    %186 = tpu.matmul %185, %182, %cst_74 {dimension_numbers = #tpu.dot_dimension_numbers<[1], [0], [0], [1], [0, 0, 1, 1], [], []>} : vector<16x32xbf16>, vector<32x64xbf16>, vector<16x64xf32> -> vector<16x64xf32>
    %187 = vector.broadcast %184 : vector<1x64xf32> to vector<16x64xf32>
    %188 = arith.addf %186, %187 : vector<16x64xf32>
    %cst_75 = arith.constant 5.000000e-01 : f32
    %189 = vector.broadcast %cst_75 : f32 to vector<16x64xf32>
    %190 = arith.mulf %189, %188 : vector<16x64xf32>
    %cst_76 = arith.constant 0.707106769 : f32
    %191 = vector.broadcast %cst_76 : f32 to vector<16x64xf32>
    %192 = arith.mulf %188, %191 : vector<16x64xf32>
    %193 = math.erf %192 : vector<16x64xf32>
    %cst_77 = arith.constant 1.000000e+00 : f32
    %194 = vector.broadcast %cst_77 : f32 to vector<16x64xf32>
    %195 = arith.addf %194, %193 : vector<16x64xf32>
    %196 = arith.mulf %190, %195 : vector<16x64xf32>
    %c0_78 = arith.constant 0 : index
    %c0_79 = arith.constant 0 : index
    %c0_80 = arith.constant 0 : index
    %197 = vector.load %arg14[%c0_78, %c0_79, %c0_80] : memref<2x64x32xbf16, #tpu.memory_space<vmem>>, vector<1x64x32xbf16>
    %198 = vector.shape_cast %197 : vector<1x64x32xbf16> to vector<64x32xbf16>
    %c0_81 = arith.constant 0 : index
    %c0_82 = arith.constant 0 : index
    %c0_83 = arith.constant 0 : index
    %199 = vector.load %arg15[%c0_81, %c0_82, %c0_83] : memref<2x1x32xf32, #tpu.memory_space<vmem>>, vector<1x1x32xf32>
    %200 = vector.shape_cast %199 : vector<1x1x32xf32> to vector<1x32xf32>
    %201 = arith.truncf %196 : vector<16x64xf32> to vector<16x64xbf16>
    %cst_84 = arith.constant dense<0.000000e+00> : vector<16x32xf32>
    %202 = tpu.matmul %201, %198, %cst_84 {dimension_numbers = #tpu.dot_dimension_numbers<[1], [0], [0], [1], [0, 0, 1, 1], [], []>} : vector<16x64xbf16>, vector<64x32xbf16>, vector<16x32xf32> -> vector<16x32xf32>
    %203 = vector.broadcast %200 : vector<1x32xf32> to vector<16x32xf32>
    %204 = arith.addf %202, %203 : vector<16x32xf32>
    %205 = arith.addf %154, %204 : vector<16x32xf32>
    %c1_85 = arith.constant 1 : index
    %c0_86 = arith.constant 0 : index
    %c0_87 = arith.constant 0 : index
    %206 = vector.load %arg4[%c1_85, %c0_86, %c0_87] : memref<2x1x32xf32, #tpu.memory_space<vmem>>, vector<1x1x32xf32>
    %207 = vector.shape_cast %206 : vector<1x1x32xf32> to vector<1x32xf32>
    %c1_88 = arith.constant 1 : index
    %c0_89 = arith.constant 0 : index
    %c0_90 = arith.constant 0 : index
    %208 = vector.load %arg5[%c1_88, %c0_89, %c0_90] : memref<2x1x32xf32, #tpu.memory_space<vmem>>, vector<1x1x32xf32>
    %209 = vector.shape_cast %208 : vector<1x1x32xf32> to vector<1x32xf32>
    %cst_91 = arith.constant dense<0.000000e+00> : vector<16xf32>
    %210 = vector.multi_reduction <add>, %205, %cst_91 [1] : vector<16x32xf32> to vector<16xf32>
    %211 = vector.shape_cast %210 : vector<16xf32> to vector<16x1xf32>
    %cst_92 = arith.constant 3.200000e+01 : f32
    %212 = vector.broadcast %cst_92 : f32 to vector<16x1xf32>
    %213 = arith.divf %211, %212 : vector<16x1xf32>
    %214 = vector.broadcast %213 : vector<16x1xf32> to vector<16x32xf32>
    %215 = arith.subf %205, %214 : vector<16x32xf32>
    %216 = arith.mulf %215, %215 : vector<16x32xf32>
    %cst_93 = arith.constant dense<0.000000e+00> : vector<16xf32>
    %217 = vector.multi_reduction <add>, %216, %cst_93 [1] : vector<16x32xf32> to vector<16xf32>
    %218 = vector.shape_cast %217 : vector<16xf32> to vector<16x1xf32>
    %cst_94 = arith.constant 3.200000e+01 : f32
    %219 = vector.broadcast %cst_94 : f32 to vector<16x1xf32>
    %220 = arith.divf %218, %219 : vector<16x1xf32>
    %221 = vector.broadcast %213 : vector<16x1xf32> to vector<16x32xf32>
    %222 = arith.subf %205, %221 : vector<16x32xf32>
    %cst_95 = arith.constant 9.99999974E-6 : f32
    %223 = vector.broadcast %cst_95 : f32 to vector<16x1xf32>
    %224 = arith.addf %220, %223 : vector<16x1xf32>
    %225 = math.rsqrt %224 : vector<16x1xf32>
    %226 = vector.broadcast %225 : vector<16x1xf32> to vector<16x32xf32>
    %227 = arith.mulf %222, %226 : vector<16x32xf32>
    %228 = vector.broadcast %207 : vector<1x32xf32> to vector<16x32xf32>
    %229 = arith.mulf %227, %228 : vector<16x32xf32>
    %230 = vector.broadcast %209 : vector<1x32xf32> to vector<16x32xf32>
    %231 = arith.addf %229, %230 : vector<16x32xf32>
    %c1_96 = arith.constant 1 : index
    %c0_97 = arith.constant 0 : index
    %c0_98 = arith.constant 0 : index
    %232 = vector.load %arg6[%c1_96, %c0_97, %c0_98] : memref<2x32x160xbf16, #tpu.memory_space<vmem>>, vector<1x32x160xbf16>
    %233 = vector.shape_cast %232 : vector<1x32x160xbf16> to vector<32x160xbf16>
    %c1_99 = arith.constant 1 : index
    %c0_100 = arith.constant 0 : index
    %c0_101 = arith.constant 0 : index
    %234 = vector.load %arg7[%c1_99, %c0_100, %c0_101] : memref<2x1x160xf32, #tpu.memory_space<vmem>>, vector<1x1x160xf32>
    %235 = vector.shape_cast %234 : vector<1x1x160xf32> to vector<1x160xf32>
    %236 = arith.truncf %231 : vector<16x32xf32> to vector<16x32xbf16>
    %cst_102 = arith.constant dense<0.000000e+00> : vector<16x160xf32>
    %237 = tpu.matmul %236, %233, %cst_102 {dimension_numbers = #tpu.dot_dimension_numbers<[1], [0], [0], [1], [0, 0, 1, 1], [], []>} : vector<16x32xbf16>, vector<32x160xbf16>, vector<16x160xf32> -> vector<16x160xf32>
    %238 = vector.broadcast %235 : vector<1x160xf32> to vector<16x160xf32>
    %239 = arith.addf %237, %238 : vector<16x160xf32>
    %240 = vector.extract_strided_slice %239 {offsets = [0, 0], sizes = [16, 32], strides = [1, 1]} : vector<16x160xf32> to vector<16x32xf32>
    %241 = arith.mulf %240, %1 : vector<16x32xf32>
    %242 = vector.extract_strided_slice %239 {offsets = [0, 32], sizes = [16, 32], strides = [1, 1]} : vector<16x160xf32> to vector<16x32xf32>
    %243 = arith.mulf %242, %2 : vector<16x32xf32>
    %244 = arith.addf %241, %243 : vector<16x32xf32>
    %245 = vector.extract_strided_slice %239 {offsets = [0, 64], sizes = [16, 32], strides = [1, 1]} : vector<16x160xf32> to vector<16x32xf32>
    %246 = arith.mulf %245, %1 : vector<16x32xf32>
    %247 = vector.extract_strided_slice %239 {offsets = [0, 96], sizes = [16, 32], strides = [1, 1]} : vector<16x160xf32> to vector<16x32xf32>
    %248 = arith.mulf %247, %2 : vector<16x32xf32>
    %249 = arith.addf %246, %248 : vector<16x32xf32>
    %250 = vector.extract_strided_slice %239 {offsets = [0, 128], sizes = [16, 32], strides = [1, 1]} : vector<16x160xf32> to vector<16x32xf32>
    %cst_103 = arith.constant 0.000000e+00 : f32
    %251 = vector.broadcast %cst_103 : f32 to vector<16x32xf32>
    %252 = vector.extract_strided_slice %244 {offsets = [0, 0], sizes = [16, 8], strides = [1, 1]} : vector<16x32xf32> to vector<16x8xf32>
    %253 = arith.truncf %252 : vector<16x8xf32> to vector<16x8xbf16>
    %254 = vector.extract_strided_slice %249 {offsets = [0, 0], sizes = [16, 8], strides = [1, 1]} : vector<16x32xf32> to vector<16x8xf32>
    %255 = arith.truncf %254 : vector<16x8xf32> to vector<16x8xbf16>
    %256 = vector.extract_strided_slice %250 {offsets = [0, 0], sizes = [16, 8], strides = [1, 1]} : vector<16x32xf32> to vector<16x8xf32>
    %257 = arith.truncf %256 : vector<16x8xf32> to vector<16x8xbf16>
    %cst_104 = arith.constant dense<0.000000e+00> : vector<16x16xf32>
    %258 = tpu.matmul %253, %255, %cst_104 {dimension_numbers = #tpu.dot_dimension_numbers<[1], [1], [0], [0], [0, 0, 1, 0], [], []>} : vector<16x8xbf16>, vector<16x8xbf16>, vector<16x16xf32> -> vector<16x16xf32>
    %259 = arith.addf %258, %3 : vector<16x16xf32>
    %cst_105 = arith.constant dense<0xFF800000> : vector<16xf32>
    %260 = vector.multi_reduction <maximumf>, %259, %cst_105 [1] : vector<16x16xf32> to vector<16xf32>
    %261 = vector.shape_cast %260 : vector<16xf32> to vector<16x1xf32>
    %262 = vector.broadcast %261 : vector<16x1xf32> to vector<16x16xf32>
    %263 = arith.subf %259, %262 : vector<16x16xf32>
    %264 = math.exp %263 : vector<16x16xf32>
    %cst_106 = arith.constant dense<0.000000e+00> : vector<16xf32>
    %265 = vector.multi_reduction <add>, %264, %cst_106 [1] : vector<16x16xf32> to vector<16xf32>
    %266 = vector.shape_cast %265 : vector<16xf32> to vector<16x1xf32>
    %267 = tpu.reciprocal %266 {approx = true} : vector<16x1xf32> -> vector<16x1xf32>
    %268 = vector.broadcast %267 : vector<16x1xf32> to vector<16x16xf32>
    %269 = arith.mulf %264, %268 : vector<16x16xf32>
    %270 = arith.truncf %269 : vector<16x16xf32> to vector<16x16xbf16>
    %cst_107 = arith.constant dense<0.000000e+00> : vector<16x8xf32>
    %271 = tpu.matmul %270, %257, %cst_107 {dimension_numbers = #tpu.dot_dimension_numbers<[1], [0], [0], [1], [0, 0, 1, 1], [], []>} : vector<16x16xbf16>, vector<16x8xbf16>, vector<16x8xf32> -> vector<16x8xf32>
    %272 = arith.truncf %271 : vector<16x8xf32> to vector<16x8xbf16>
    %c4 = arith.constant 4 : index
    %c0_108 = arith.constant 0 : index
    %c0_109 = arith.constant 0 : index
    %273 = vector.load %arg8[%c4, %c0_108, %c0_109] : memref<8x8x32xbf16, #tpu.memory_space<vmem>>, vector<1x8x32xbf16>
    %274 = vector.shape_cast %273 : vector<1x8x32xbf16> to vector<8x32xbf16>
    %cst_110 = arith.constant dense<0.000000e+00> : vector<16x32xf32>
    %275 = tpu.matmul %272, %274, %cst_110 {dimension_numbers = #tpu.dot_dimension_numbers<[1], [0], [0], [1], [0, 0, 1, 1], [], []>} : vector<16x8xbf16>, vector<8x32xbf16>, vector<16x32xf32> -> vector<16x32xf32>
    %276 = arith.addf %251, %275 : vector<16x32xf32>
    %277 = vector.extract_strided_slice %244 {offsets = [0, 8], sizes = [16, 8], strides = [1, 1]} : vector<16x32xf32> to vector<16x8xf32>
    %278 = arith.truncf %277 : vector<16x8xf32> to vector<16x8xbf16>
    %279 = vector.extract_strided_slice %249 {offsets = [0, 8], sizes = [16, 8], strides = [1, 1]} : vector<16x32xf32> to vector<16x8xf32>
    %280 = arith.truncf %279 : vector<16x8xf32> to vector<16x8xbf16>
    %281 = vector.extract_strided_slice %250 {offsets = [0, 8], sizes = [16, 8], strides = [1, 1]} : vector<16x32xf32> to vector<16x8xf32>
    %282 = arith.truncf %281 : vector<16x8xf32> to vector<16x8xbf16>
    %cst_111 = arith.constant dense<0.000000e+00> : vector<16x16xf32>
    %283 = tpu.matmul %278, %280, %cst_111 {dimension_numbers = #tpu.dot_dimension_numbers<[1], [1], [0], [0], [0, 0, 1, 0], [], []>} : vector<16x8xbf16>, vector<16x8xbf16>, vector<16x16xf32> -> vector<16x16xf32>
    %284 = arith.addf %283, %3 : vector<16x16xf32>
    %cst_112 = arith.constant dense<0xFF800000> : vector<16xf32>
    %285 = vector.multi_reduction <maximumf>, %284, %cst_112 [1] : vector<16x16xf32> to vector<16xf32>
    %286 = vector.shape_cast %285 : vector<16xf32> to vector<16x1xf32>
    %287 = vector.broadcast %286 : vector<16x1xf32> to vector<16x16xf32>
    %288 = arith.subf %284, %287 : vector<16x16xf32>
    %289 = math.exp %288 : vector<16x16xf32>
    %cst_113 = arith.constant dense<0.000000e+00> : vector<16xf32>
    %290 = vector.multi_reduction <add>, %289, %cst_113 [1] : vector<16x16xf32> to vector<16xf32>
    %291 = vector.shape_cast %290 : vector<16xf32> to vector<16x1xf32>
    %292 = tpu.reciprocal %291 {approx = true} : vector<16x1xf32> -> vector<16x1xf32>
    %293 = vector.broadcast %292 : vector<16x1xf32> to vector<16x16xf32>
    %294 = arith.mulf %289, %293 : vector<16x16xf32>
    %295 = arith.truncf %294 : vector<16x16xf32> to vector<16x16xbf16>
    %cst_114 = arith.constant dense<0.000000e+00> : vector<16x8xf32>
    %296 = tpu.matmul %295, %282, %cst_114 {dimension_numbers = #tpu.dot_dimension_numbers<[1], [0], [0], [1], [0, 0, 1, 1], [], []>} : vector<16x16xbf16>, vector<16x8xbf16>, vector<16x8xf32> -> vector<16x8xf32>
    %297 = arith.truncf %296 : vector<16x8xf32> to vector<16x8xbf16>
    %c5 = arith.constant 5 : index
    %c0_115 = arith.constant 0 : index
    %c0_116 = arith.constant 0 : index
    %298 = vector.load %arg8[%c5, %c0_115, %c0_116] : memref<8x8x32xbf16, #tpu.memory_space<vmem>>, vector<1x8x32xbf16>
    %299 = vector.shape_cast %298 : vector<1x8x32xbf16> to vector<8x32xbf16>
    %cst_117 = arith.constant dense<0.000000e+00> : vector<16x32xf32>
    %300 = tpu.matmul %297, %299, %cst_117 {dimension_numbers = #tpu.dot_dimension_numbers<[1], [0], [0], [1], [0, 0, 1, 1], [], []>} : vector<16x8xbf16>, vector<8x32xbf16>, vector<16x32xf32> -> vector<16x32xf32>
    %301 = arith.addf %276, %300 : vector<16x32xf32>
    %302 = vector.extract_strided_slice %244 {offsets = [0, 16], sizes = [16, 8], strides = [1, 1]} : vector<16x32xf32> to vector<16x8xf32>
    %303 = arith.truncf %302 : vector<16x8xf32> to vector<16x8xbf16>
    %304 = vector.extract_strided_slice %249 {offsets = [0, 16], sizes = [16, 8], strides = [1, 1]} : vector<16x32xf32> to vector<16x8xf32>
    %305 = arith.truncf %304 : vector<16x8xf32> to vector<16x8xbf16>
    %306 = vector.extract_strided_slice %250 {offsets = [0, 16], sizes = [16, 8], strides = [1, 1]} : vector<16x32xf32> to vector<16x8xf32>
    %307 = arith.truncf %306 : vector<16x8xf32> to vector<16x8xbf16>
    %cst_118 = arith.constant dense<0.000000e+00> : vector<16x16xf32>
    %308 = tpu.matmul %303, %305, %cst_118 {dimension_numbers = #tpu.dot_dimension_numbers<[1], [1], [0], [0], [0, 0, 1, 0], [], []>} : vector<16x8xbf16>, vector<16x8xbf16>, vector<16x16xf32> -> vector<16x16xf32>
    %309 = arith.addf %308, %3 : vector<16x16xf32>
    %cst_119 = arith.constant dense<0xFF800000> : vector<16xf32>
    %310 = vector.multi_reduction <maximumf>, %309, %cst_119 [1] : vector<16x16xf32> to vector<16xf32>
    %311 = vector.shape_cast %310 : vector<16xf32> to vector<16x1xf32>
    %312 = vector.broadcast %311 : vector<16x1xf32> to vector<16x16xf32>
    %313 = arith.subf %309, %312 : vector<16x16xf32>
    %314 = math.exp %313 : vector<16x16xf32>
    %cst_120 = arith.constant dense<0.000000e+00> : vector<16xf32>
    %315 = vector.multi_reduction <add>, %314, %cst_120 [1] : vector<16x16xf32> to vector<16xf32>
    %316 = vector.shape_cast %315 : vector<16xf32> to vector<16x1xf32>
    %317 = tpu.reciprocal %316 {approx = true} : vector<16x1xf32> -> vector<16x1xf32>
    %318 = vector.broadcast %317 : vector<16x1xf32> to vector<16x16xf32>
    %319 = arith.mulf %314, %318 : vector<16x16xf32>
    %320 = arith.truncf %319 : vector<16x16xf32> to vector<16x16xbf16>
    %cst_121 = arith.constant dense<0.000000e+00> : vector<16x8xf32>
    %321 = tpu.matmul %320, %307, %cst_121 {dimension_numbers = #tpu.dot_dimension_numbers<[1], [0], [0], [1], [0, 0, 1, 1], [], []>} : vector<16x16xbf16>, vector<16x8xbf16>, vector<16x8xf32> -> vector<16x8xf32>
    %322 = arith.truncf %321 : vector<16x8xf32> to vector<16x8xbf16>
    %c6 = arith.constant 6 : index
    %c0_122 = arith.constant 0 : index
    %c0_123 = arith.constant 0 : index
    %323 = vector.load %arg8[%c6, %c0_122, %c0_123] : memref<8x8x32xbf16, #tpu.memory_space<vmem>>, vector<1x8x32xbf16>
    %324 = vector.shape_cast %323 : vector<1x8x32xbf16> to vector<8x32xbf16>
    %cst_124 = arith.constant dense<0.000000e+00> : vector<16x32xf32>
    %325 = tpu.matmul %322, %324, %cst_124 {dimension_numbers = #tpu.dot_dimension_numbers<[1], [0], [0], [1], [0, 0, 1, 1], [], []>} : vector<16x8xbf16>, vector<8x32xbf16>, vector<16x32xf32> -> vector<16x32xf32>
    %326 = arith.addf %301, %325 : vector<16x32xf32>
    %327 = vector.extract_strided_slice %244 {offsets = [0, 24], sizes = [16, 8], strides = [1, 1]} : vector<16x32xf32> to vector<16x8xf32>
    %328 = arith.truncf %327 : vector<16x8xf32> to vector<16x8xbf16>
    %329 = vector.extract_strided_slice %249 {offsets = [0, 24], sizes = [16, 8], strides = [1, 1]} : vector<16x32xf32> to vector<16x8xf32>
    %330 = arith.truncf %329 : vector<16x8xf32> to vector<16x8xbf16>
    %331 = vector.extract_strided_slice %250 {offsets = [0, 24], sizes = [16, 8], strides = [1, 1]} : vector<16x32xf32> to vector<16x8xf32>
    %332 = arith.truncf %331 : vector<16x8xf32> to vector<16x8xbf16>
    %cst_125 = arith.constant dense<0.000000e+00> : vector<16x16xf32>
    %333 = tpu.matmul %328, %330, %cst_125 {dimension_numbers = #tpu.dot_dimension_numbers<[1], [1], [0], [0], [0, 0, 1, 0], [], []>} : vector<16x8xbf16>, vector<16x8xbf16>, vector<16x16xf32> -> vector<16x16xf32>
    %334 = arith.addf %333, %3 : vector<16x16xf32>
    %cst_126 = arith.constant dense<0xFF800000> : vector<16xf32>
    %335 = vector.multi_reduction <maximumf>, %334, %cst_126 [1] : vector<16x16xf32> to vector<16xf32>
    %336 = vector.shape_cast %335 : vector<16xf32> to vector<16x1xf32>
    %337 = vector.broadcast %336 : vector<16x1xf32> to vector<16x16xf32>
    %338 = arith.subf %334, %337 : vector<16x16xf32>
    %339 = math.exp %338 : vector<16x16xf32>
    %cst_127 = arith.constant dense<0.000000e+00> : vector<16xf32>
    %340 = vector.multi_reduction <add>, %339, %cst_127 [1] : vector<16x16xf32> to vector<16xf32>
    %341 = vector.shape_cast %340 : vector<16xf32> to vector<16x1xf32>
    %342 = tpu.reciprocal %341 {approx = true} : vector<16x1xf32> -> vector<16x1xf32>
    %343 = vector.broadcast %342 : vector<16x1xf32> to vector<16x16xf32>
    %344 = arith.mulf %339, %343 : vector<16x16xf32>
    %345 = arith.truncf %344 : vector<16x16xf32> to vector<16x16xbf16>
    %cst_128 = arith.constant dense<0.000000e+00> : vector<16x8xf32>
    %346 = tpu.matmul %345, %332, %cst_128 {dimension_numbers = #tpu.dot_dimension_numbers<[1], [0], [0], [1], [0, 0, 1, 1], [], []>} : vector<16x16xbf16>, vector<16x8xbf16>, vector<16x8xf32> -> vector<16x8xf32>
    %347 = arith.truncf %346 : vector<16x8xf32> to vector<16x8xbf16>
    %c7 = arith.constant 7 : index
    %c0_129 = arith.constant 0 : index
    %c0_130 = arith.constant 0 : index
    %348 = vector.load %arg8[%c7, %c0_129, %c0_130] : memref<8x8x32xbf16, #tpu.memory_space<vmem>>, vector<1x8x32xbf16>
    %349 = vector.shape_cast %348 : vector<1x8x32xbf16> to vector<8x32xbf16>
    %cst_131 = arith.constant dense<0.000000e+00> : vector<16x32xf32>
    %350 = tpu.matmul %347, %349, %cst_131 {dimension_numbers = #tpu.dot_dimension_numbers<[1], [0], [0], [1], [0, 0, 1, 1], [], []>} : vector<16x8xbf16>, vector<8x32xbf16>, vector<16x32xf32> -> vector<16x32xf32>
    %351 = arith.addf %326, %350 : vector<16x32xf32>
    %352 = arith.addf %205, %351 : vector<16x32xf32>
    %c1_132 = arith.constant 1 : index
    %c0_133 = arith.constant 0 : index
    %c0_134 = arith.constant 0 : index
    %353 = vector.load %arg9[%c1_132, %c0_133, %c0_134] : memref<2x1x32xf32, #tpu.memory_space<vmem>>, vector<1x1x32xf32>
    %354 = vector.shape_cast %353 : vector<1x1x32xf32> to vector<1x32xf32>
    %355 = vector.broadcast %354 : vector<1x32xf32> to vector<16x32xf32>
    %356 = arith.addf %352, %355 : vector<16x32xf32>
    %c1_135 = arith.constant 1 : index
    %c0_136 = arith.constant 0 : index
    %c0_137 = arith.constant 0 : index
    %357 = vector.load %arg10[%c1_135, %c0_136, %c0_137] : memref<2x1x32xf32, #tpu.memory_space<vmem>>, vector<1x1x32xf32>
    %358 = vector.shape_cast %357 : vector<1x1x32xf32> to vector<1x32xf32>
    %c1_138 = arith.constant 1 : index
    %c0_139 = arith.constant 0 : index
    %c0_140 = arith.constant 0 : index
    %359 = vector.load %arg11[%c1_138, %c0_139, %c0_140] : memref<2x1x32xf32, #tpu.memory_space<vmem>>, vector<1x1x32xf32>
    %360 = vector.shape_cast %359 : vector<1x1x32xf32> to vector<1x32xf32>
    %cst_141 = arith.constant dense<0.000000e+00> : vector<16xf32>
    %361 = vector.multi_reduction <add>, %356, %cst_141 [1] : vector<16x32xf32> to vector<16xf32>
    %362 = vector.shape_cast %361 : vector<16xf32> to vector<16x1xf32>
    %cst_142 = arith.constant 3.200000e+01 : f32
    %363 = vector.broadcast %cst_142 : f32 to vector<16x1xf32>
    %364 = arith.divf %362, %363 : vector<16x1xf32>
    %365 = vector.broadcast %364 : vector<16x1xf32> to vector<16x32xf32>
    %366 = arith.subf %356, %365 : vector<16x32xf32>
    %367 = arith.mulf %366, %366 : vector<16x32xf32>
    %cst_143 = arith.constant dense<0.000000e+00> : vector<16xf32>
    %368 = vector.multi_reduction <add>, %367, %cst_143 [1] : vector<16x32xf32> to vector<16xf32>
    %369 = vector.shape_cast %368 : vector<16xf32> to vector<16x1xf32>
    %cst_144 = arith.constant 3.200000e+01 : f32
    %370 = vector.broadcast %cst_144 : f32 to vector<16x1xf32>
    %371 = arith.divf %369, %370 : vector<16x1xf32>
    %372 = vector.broadcast %364 : vector<16x1xf32> to vector<16x32xf32>
    %373 = arith.subf %356, %372 : vector<16x32xf32>
    %cst_145 = arith.constant 9.99999974E-6 : f32
    %374 = vector.broadcast %cst_145 : f32 to vector<16x1xf32>
    %375 = arith.addf %371, %374 : vector<16x1xf32>
    %376 = math.rsqrt %375 : vector<16x1xf32>
    %377 = vector.broadcast %376 : vector<16x1xf32> to vector<16x32xf32>
    %378 = arith.mulf %373, %377 : vector<16x32xf32>
    %379 = vector.broadcast %358 : vector<1x32xf32> to vector<16x32xf32>
    %380 = arith.mulf %378, %379 : vector<16x32xf32>
    %381 = vector.broadcast %360 : vector<1x32xf32> to vector<16x32xf32>
    %382 = arith.addf %380, %381 : vector<16x32xf32>
    %c1_146 = arith.constant 1 : index
    %c0_147 = arith.constant 0 : index
    %c0_148 = arith.constant 0 : index
    %383 = vector.load %arg12[%c1_146, %c0_147, %c0_148] : memref<2x32x64xbf16, #tpu.memory_space<vmem>>, vector<1x32x64xbf16>
    %384 = vector.shape_cast %383 : vector<1x32x64xbf16> to vector<32x64xbf16>
    %c1_149 = arith.constant 1 : index
    %c0_150 = arith.constant 0 : index
    %c0_151 = arith.constant 0 : index
    %385 = vector.load %arg13[%c1_149, %c0_150, %c0_151] : memref<2x1x64xf32, #tpu.memory_space<vmem>>, vector<1x1x64xf32>
    %386 = vector.shape_cast %385 : vector<1x1x64xf32> to vector<1x64xf32>
    %387 = arith.truncf %382 : vector<16x32xf32> to vector<16x32xbf16>
    %cst_152 = arith.constant dense<0.000000e+00> : vector<16x64xf32>
    %388 = tpu.matmul %387, %384, %cst_152 {dimension_numbers = #tpu.dot_dimension_numbers<[1], [0], [0], [1], [0, 0, 1, 1], [], []>} : vector<16x32xbf16>, vector<32x64xbf16>, vector<16x64xf32> -> vector<16x64xf32>
    %389 = vector.broadcast %386 : vector<1x64xf32> to vector<16x64xf32>
    %390 = arith.addf %388, %389 : vector<16x64xf32>
    %cst_153 = arith.constant 5.000000e-01 : f32
    %391 = vector.broadcast %cst_153 : f32 to vector<16x64xf32>
    %392 = arith.mulf %391, %390 : vector<16x64xf32>
    %cst_154 = arith.constant 0.707106769 : f32
    %393 = vector.broadcast %cst_154 : f32 to vector<16x64xf32>
    %394 = arith.mulf %390, %393 : vector<16x64xf32>
    %395 = math.erf %394 : vector<16x64xf32>
    %cst_155 = arith.constant 1.000000e+00 : f32
    %396 = vector.broadcast %cst_155 : f32 to vector<16x64xf32>
    %397 = arith.addf %396, %395 : vector<16x64xf32>
    %398 = arith.mulf %392, %397 : vector<16x64xf32>
    %c1_156 = arith.constant 1 : index
    %c0_157 = arith.constant 0 : index
    %c0_158 = arith.constant 0 : index
    %399 = vector.load %arg14[%c1_156, %c0_157, %c0_158] : memref<2x64x32xbf16, #tpu.memory_space<vmem>>, vector<1x64x32xbf16>
    %400 = vector.shape_cast %399 : vector<1x64x32xbf16> to vector<64x32xbf16>
    %c1_159 = arith.constant 1 : index
    %c0_160 = arith.constant 0 : index
    %c0_161 = arith.constant 0 : index
    %401 = vector.load %arg15[%c1_159, %c0_160, %c0_161] : memref<2x1x32xf32, #tpu.memory_space<vmem>>, vector<1x1x32xf32>
    %402 = vector.shape_cast %401 : vector<1x1x32xf32> to vector<1x32xf32>
    %403 = arith.truncf %398 : vector<16x64xf32> to vector<16x64xbf16>
    %cst_162 = arith.constant dense<0.000000e+00> : vector<16x32xf32>
    %404 = tpu.matmul %403, %400, %cst_162 {dimension_numbers = #tpu.dot_dimension_numbers<[1], [0], [0], [1], [0, 0, 1, 1], [], []>} : vector<16x64xbf16>, vector<64x32xbf16>, vector<16x32xf32> -> vector<16x32xf32>
    %405 = vector.broadcast %402 : vector<1x32xf32> to vector<16x32xf32>
    %406 = arith.addf %404, %405 : vector<16x32xf32>
    %407 = arith.addf %356, %406 : vector<16x32xf32>
    %c0_163 = arith.constant 0 : index
    %c0_164 = arith.constant 0 : index
    %408 = vector.load %arg16[%c0_163, %c0_164] : memref<1x32xf32, #tpu.memory_space<vmem>>, vector<1x32xf32>
    %c0_165 = arith.constant 0 : index
    %c0_166 = arith.constant 0 : index
    %409 = vector.load %arg17[%c0_165, %c0_166] : memref<1x32xf32, #tpu.memory_space<vmem>>, vector<1x32xf32>
    %cst_167 = arith.constant dense<0.000000e+00> : vector<16xf32>
    %410 = vector.multi_reduction <add>, %407, %cst_167 [1] : vector<16x32xf32> to vector<16xf32>
    %411 = vector.shape_cast %410 : vector<16xf32> to vector<16x1xf32>
    %cst_168 = arith.constant 3.200000e+01 : f32
    %412 = vector.broadcast %cst_168 : f32 to vector<16x1xf32>
    %413 = arith.divf %411, %412 : vector<16x1xf32>
    %414 = vector.broadcast %413 : vector<16x1xf32> to vector<16x32xf32>
    %415 = arith.subf %407, %414 : vector<16x32xf32>
    %416 = arith.mulf %415, %415 : vector<16x32xf32>
    %cst_169 = arith.constant dense<0.000000e+00> : vector<16xf32>
    %417 = vector.multi_reduction <add>, %416, %cst_169 [1] : vector<16x32xf32> to vector<16xf32>
    %418 = vector.shape_cast %417 : vector<16xf32> to vector<16x1xf32>
    %cst_170 = arith.constant 3.200000e+01 : f32
    %419 = vector.broadcast %cst_170 : f32 to vector<16x1xf32>
    %420 = arith.divf %418, %419 : vector<16x1xf32>
    %421 = vector.broadcast %413 : vector<16x1xf32> to vector<16x32xf32>
    %422 = arith.subf %407, %421 : vector<16x32xf32>
    %cst_171 = arith.constant 9.99999974E-6 : f32
    %423 = vector.broadcast %cst_171 : f32 to vector<16x1xf32>
    %424 = arith.addf %420, %423 : vector<16x1xf32>
    %425 = math.rsqrt %424 : vector<16x1xf32>
    %426 = vector.broadcast %425 : vector<16x1xf32> to vector<16x32xf32>
    %427 = arith.mulf %422, %426 : vector<16x32xf32>
    %428 = vector.broadcast %408 : vector<1x32xf32> to vector<16x32xf32>
    %429 = arith.mulf %427, %428 : vector<16x32xf32>
    %430 = vector.broadcast %409 : vector<1x32xf32> to vector<16x32xf32>
    %431 = arith.addf %429, %430 : vector<16x32xf32>
    %432 = vector.extract_strided_slice %431 {offsets = [0, 0], sizes = [1, 32], strides = [1, 1]} : vector<16x32xf32> to vector<1x32xf32>
    %433 = vector.extract_strided_slice %431 {offsets = [8, 0], sizes = [1, 32], strides = [1, 1]} : vector<16x32xf32> to vector<1x32xf32>
    %434 = tpu.concatenate %432, %433 in 0 : vector<1x32xf32>, vector<1x32xf32> -> vector<2x32xf32>
    %c0_172 = arith.constant 0 : index
    %c0_173 = arith.constant 0 : index
    %435 = vector.load %arg18[%c0_172, %c0_173] : memref<32x32xbf16, #tpu.memory_space<vmem>>, vector<32x32xbf16>
    %c0_174 = arith.constant 0 : index
    %c0_175 = arith.constant 0 : index
    %436 = vector.load %arg19[%c0_174, %c0_175] : memref<1x32xf32, #tpu.memory_space<vmem>>, vector<1x32xf32>
    %437 = arith.truncf %434 : vector<2x32xf32> to vector<2x32xbf16>
    %cst_176 = arith.constant dense<0.000000e+00> : vector<2x32xf32>
    %438 = tpu.matmul %437, %435, %cst_176 {dimension_numbers = #tpu.dot_dimension_numbers<[1], [0], [0], [1], [0, 0, 1, 1], [], []>} : vector<2x32xbf16>, vector<32x32xbf16>, vector<2x32xf32> -> vector<2x32xf32>
    %439 = vector.broadcast %436 : vector<1x32xf32> to vector<2x32xf32>
    %440 = arith.addf %438, %439 : vector<2x32xf32>
    %441 = math.tanh %440 : vector<2x32xf32>
    %c0_177 = arith.constant 0 : index
    %c0_178 = arith.constant 0 : index
    %442 = vector.load %arg20[%c0_177, %c0_178] : memref<2x32xf32, #tpu.memory_space<vmem>>, vector<2x32xf32>
    tpu.vector_store %arg20[%c0_177, %c0_178], %441 {strides = array<i32>} : memref<2x32xf32, #tpu.memory_space<vmem>>, vector<2x32xf32>,
    return
  }
}

</mosaic_0001>

<bundles_post_ra>
// kernel: my_model_forward.1
= control target key start
LH: loop header
LB: loop body
LE: loop exit
PB: predicated region body
PF: predicated region fallthrough
CT: control target
= control target key end

     0   :  { %s2724_s0 = inlined_call_operand.vmem [shape: f32[16,32], index: 0, kind: input, shape index: {}]   ;;  %s2725_s1 = inlined_call_operand.vmem [shape: f32[16,32], index: 1, kind: input, shape index: {}]   ;;  %s2726_s2 = inlined_call_operand.vmem [shape: f32[16,32], index: 2, kind: input, shape index: {}]   ;;  %s2727_s3 = inlined_call_operand.vmem [shape: f32[16,16], index: 3, kind: input, shape index: {}]   ;;  %s2728_s4 = inlined_call_operand.vmem [shape: f32[2,1,32], index: 4, kind: input, shape index: {}]   ;;  %s2729_s5 = inlined_call_operand.vmem [shape: f32[2,1,32], index: 5, kind: input, shape index: {}]   ;;  %s2730_s6 = inlined_call_operand.vmem [shape: bf16[2,32,160], index: 6, kind: input, shape index: {}]   ;;  %s2731_s7 = inlined_call_operand.vmem [shape: f32[2,1,160], index: 7, kind: input, shape index: {}]   ;;  %s2732_s8 = inlined_call_operand.vmem [shape: bf16[8,8,32], index: 8, kind: input, shape index: {}]   ;;  %s2733_s9 = inlined_call_operand.vmem [shape: f32[2,1,32], index: 9, kind: input, shape index: {}]   ;;  %s2734_s10 = inlined_call_operand.vmem [shape: f32[2,1,32], index: 10, kind: input, shape index: {}]   ;;  %s2735_s11 = inlined_call_operand.vmem [shape: f32[2,1,32], index: 11, kind: input, shape index: {}]   ;;  %s2736_s12 = inlined_call_operand.vmem [shape: bf16[2,32,64], index: 12, kind: input, shape index: {}]   ;;  %s2737_s13 = inlined_call_operand.vmem [shape: f32[2,1,64], index: 13, kind: input, shape index: {}]   ;;  %s2738_s14 = inlined_call_operand.vmem [shape: bf16[2,64,32], index: 14, kind: input, shape index: {}]   ;;  %s2739_s15 = inlined_call_operand.vmem [shape: f32[2,1,32], index: 15, kind: input, shape index: {}]   ;;  %s2740_s16 = inlined_call_operand.vmem [shape: f32[1,32], index: 16, kind: input, shape index: {}]   ;;  %s2741_s17 = inlined_call_operand.vmem [shape: f32[1,32], index: 17, kind: input, shape index: {}]   ;;  %s2742_s18 = inlined_call_operand.vmem [shape: bf16[32,32], index: 18, kind: input, shape index: {}]   ;;  %s2743_s19 = inlined_call_operand.vmem [shape: f32[1,32], index: 19, kind: input, shape index: {}]   ;;  %s2744_s20 = inlined_call_operand.hbm [shape: f32[2,32], index: 20, kind: output, shape index: {}]  }
   0x1   :  { %2756 = sst [smem:[#allocation5_spill]] %s2724_s0 }
   0x2   :  { %2757 = sst [smem:[#allocation6_spill]] %s2725_s1 }
   0x3   :  { %2758 = sst [smem:[#allocation7_spill]] %s2726_s2 }
   0x4   :  { %2759 = sst [smem:[#allocation8_spill]] %s2727_s3 }
   0x5   :  { %2760 = sst [smem:[#allocation9_spill]] %s2728_s4 }
   0x6   :  { %s2761_s23 = sld [smem:[#allocation5_spill]]  ;;  %vm77_vm0 = vcmask 261120  }
   0xc   :  { %v2201_v0 = vld [vmem:[%s2761_s23] sm:$0xff]  ;;  %v2208_v2 = vld [vmem:[%s2761_s23 + $0x8] sm:$0xff] }
   0xd   :  { %v78_v1 = vsel %vm77_vm0, %v2201_v0, 0.0 }
   0xe   :  { %79 = vadd.xlane.f32.xlu0 %v78_v1 }
   0xf   :  { %25 = vsyncpa [#allocation3], 0  ;;  %v81_v3 = vsel %vm77_vm0, %v2208_v2, 0.0  ;;  %v2082_v4 = vmov 32.0   ;;  %v1760_v21 = vld [vmem:[%s2730_s6 + $0x10] sm:$0xf] }
  0x10   :  { %1956 = vrcp.f32 %v2082_v4  ;;  %v1909_v22 = vld [vmem:[%s2730_s6 + $0x14] sm:$0xf0]  ;;  %v1908_v23 = vld [vmem:[%s2730_s6 + $0x14] sm:$0xf]  ;;  %v1762_v25 = vld [vmem:[%s2730_s6 + $0x18] sm:$0xf0] }
  0x11   :  { %v1761_v24 = vor.u32 %v1909_v22, %v1760_v21  ;;  %v1765_v26 = vor.u32 %v1908_v23, %v1762_v25  ;;  %v1752_v27 = vld [vmem:[%s2730_s6] sm:$0xf]  ;;  %v1907_v28 = vld [vmem:[%s2730_s6 + $0x4] sm:$0xf0]  ;;  %v1906_v29 = vld [vmem:[%s2730_s6 + $0x4] sm:$0xf] }
  0x12   :  { %v1753_v31 = vor.u32 %v1907_v28, %v1752_v27  ;;  %v1754_v32 = vld [vmem:[%s2730_s6 + $0x8] sm:$0xf0]  ;;  %s2762_s27 = sld [smem:[#allocation6_spill]]  ;;  %s2083_s29 = smov 64   ;;  %v1940_v61 = vld [vmem:[%s2729_s5] ss:$0 sm:$0xff] }
  0x13   :  { %179 = vmatpush.bf16.msra.mxu0 %v1761_v24  ;;  %193 = vmatpush.bf16.msra.mxu1 %v1765_v26  ;;  %v1757_v34 = vor.u32 %v1906_v29, %v1754_v32  ;;  %s2763_s21 = sld [smem:[#allocation7_spill]]  ;;  %s2084_s1 = smov 96   ;;  %v143_v4 = vld [vmem:[%s2731_s7] sm:$0x3]  ;;  %vm257_vm8 = vcmask 64512   ;;  %vm278_vm9 = vcmask 130048  }
  0x14   :  { %s2085_s24 = smov 32   ;;  %s2764_s3 = sld [smem:[#allocation9_spill]]  ;;  %vm396_vm10 = vcmask 1043456  }
  0x15   :  { %s2765_s22 = sld [smem:[#allocation8_spill]]  ;;  %s2086_s2 = smov 56  }
  0x16   :  { %82 = vadd.xlane.f32.xlu0 %v81_v3  ;;  %v1957_v5 = vpop.eup %1956  ;;  %s2751_s25 = smov 104   ;;  %s2754_s26 = smov 120  }
  0x17   :  { %v85_v6 = vmul.f32 32.0, %v1957_v5  ;;  %vm89_vm1 = vweird.f32 %v1957_v5  ;;  %180 = vmatpush.bf16.msra.mxu0 %v1753_v31  ;;  %194 = vmatpush.bf16.msra.mxu1 %v1757_v34  ;;  %s2750_s28 = smov 48   ;;  %s2753_s4 = smov 40  }
  0x18   :  { %v2252_v36 = vld [vmem:[%s2762_s27] sm:$0xff]  ;;  %v2257_v37 = vld [vmem:[%s2762_s27 + $0x8] sm:$0xff]  ;;  %s2091_s30 = smov 112  }
  0x19   :  { %v86_v7 = vsub.f32 1.0, %v85_v6  ;;  %v2266_v39 = vld [vmem:[%s2763_s21] sm:$0xff]  ;;  %v72_v44 = vld [vmem:[%s2763_s21 + $0x8] sm:$0xff] }
  0x1a   :  { %233 = vrot.lane.b32.xlu2 %v2266_v39, %s2084_s1  ;;  %v1939_v56 = vld [vmem:[%s2764_s3] ss:$0 sm:$0xff] }
  0x1b   :  { %v87_v8 = vmul.f32 %v1957_v5, %v86_v7 }
  0x1d   :  { %v88_v9 = vadd.f32 %v1957_v5, %v87_v8 }
  0x1f   :  { %v2212_v10 = vsel %vm89_vm1, %v1957_v5, %v88_v9  ;;  %v146_v5 = vperm.slane %v143_v4, 0 }
  0x22   :  { %235 = vrot.lane.b32.xlu2 %v72_v44, %s2084_s1 }
  0x2a   :  { %225 = vrot.lane.b32.xlu0 %v2252_v36, %s2083_s29 }
  0x32   :  { %207 = vrot.lane.b32.xlu0 %v72_v44, %s2085_s24 }
  0x74   :  { %v2288_v6 = vpop.permute.xlu2 %233 }
  0x81   :  { %v80_v11 = vpop.xlane.xlu0 %79 }
  0x82   :  { %v91_v12 = vmul.f32 %v2212_v10, %v80_v11 }
  0x84   :  { %v93_v13 = vsub.f32 %v2201_v0, %v91_v12 }
  0x86   :  { %v95_v14 = vmul.f32 %v93_v13, %v93_v13 }
  0x88   :  { %v97_v15 = vsel %vm77_vm0, %v95_v14, 0.0  ;;  %v2294_v14 = vpop.permute.xlu2 %235 }
  0x89   :  { %98 = vadd.xlane.f32.xlu1 %v97_v15  ;;  %v83_v16 = vpop.xlane.xlu0 %82 }
  0x8a   :  { %v92_v17 = vmul.f32 %v2212_v10, %v83_v16 }
  0x8c   :  { %v2219_v18 = vsub.f32 %v2208_v2, %v92_v17 }
  0x8e   :  { %v96_v19 = vmul.f32 %v2219_v18, %v2219_v18 }
  0x90   :  { %v100_v20 = vsel %vm77_vm0, %v96_v19, 0.0 }
  0x91   :  { %101 = vadd.xlane.f32.xlu1 %v100_v20 }
  0x9c   :  { %v2290_v7 = vpop.permute.xlu0 %225 }
  0xa4   :  { %v2296_v15 = vpop.permute.xlu0 %207 }
  0xaa   :  { %227 = vrot.lane.b32.xlu1 %v2257_v37, %s2083_s29 }
  0xfc   :  { %v99_v30 = vpop.xlane.xlu1 %98 }
  0xfd   :  { %v103_v33 = vmul.f32 %v99_v30, %v2212_v10 }
  0xff   :  { %v105_v35 = vadd.f32 1e-05, %v103_v33 }
 0x101   :  { %1958 = vrsqrt.f32 %v105_v35  ;;  %vm113_vm3 = vweird.f32 %v105_v35 }
 0x104   :  { %v102_v38 = vpop.xlane.xlu1 %101 }
 0x105   :  { %v104_v40 = vmul.f32 %v102_v38, %v2212_v10 }
 0x107   :  { %v1959_v41 = vpop.eup %1958  ;;  %v106_v42 = vadd.f32 1e-05, %v104_v40 }
 0x108   :  { %v108_v43 = vmul.f32 %v1959_v41, %v105_v35  ;;  %vm114_vm2 = vweird.f32 %v1959_v41 }
 0x109   :  { %1960 = vrsqrt.f32 %v106_v42  ;;  %vm115_vm4 = vmor %vm113_vm3, %vm114_vm2  ;;  %vm123_vm6 = vweird.f32 %v106_v42 }
 0x10a   :  { %v109_v45 = vmul.f32 %v1959_v41, %v108_v43 }
 0x10c   :  { %v110_v46 = vmul.f32 0.5, %v109_v45  ;;  %v2323_v45 = vld [vmem:[%s2765_s22] sm:$0xff] }
 0x10e   :  { %v111_v47 = vsub.f32 1.5, %v110_v46 }
 0x10f   :  { %v1961_v48 = vpop.eup %1960 }
 0x110   :  { %v112_v49 = vmul.f32 %v1959_v41, %v111_v47  ;;  %v118_v50 = vmul.f32 %v1961_v48, %v106_v42  ;;  %vm124_vm5 = vweird.f32 %v1961_v48 }
 0x111   :  { %vm125_vm7 = vmor %vm123_vm6, %vm124_vm5 }
 0x112   :  { %v119_v51 = vmul.f32 %v1961_v48, %v118_v50  ;;  %v116_v52 = vsel %vm115_vm4, %v1959_v41, %v112_v49 }
 0x113   :  { %v127_v55 = vmul.f32 %v116_v52, %v93_v13  ;;  %v147_v13 = vperm.slane %v143_v4, 1 }
 0x114   :  { %v120_v53 = vmul.f32 0.5, %v119_v51 }
 0x115   :  { %v132_v60 = vmul.f32 %v1939_v56, %v127_v55 }
 0x116   :  { %v121_v54 = vsub.f32 1.5, %v120_v53 }
 0x117   :  { %v137_v63 = vadd.f32 %v1940_v61, %v132_v60 }
 0x118   :  { %v122_v57 = vmul.f32 %v1961_v48, %v121_v54 }
 0x11a   :  { %v126_v58 = vsel %vm125_vm7, %v1961_v48, %v122_v57 }
 0x11b   :  { %v128_v59 = vmul.f32 %v126_v58, %v2219_v18 }
 0x11c   :  { %v2307_v25 = vpop.permute.xlu1 %227 }
 0x11d   :  { %v133_v62 = vmul.f32 %v1939_v56, %v128_v59 }
 0x11f   :  { %v138_v1 = vadd.f32 %v1940_v61, %v133_v62 }
 0x121   :  { %v144_v3 = vpack.c.bf16 %v138_v1, %v137_v63  ;;  %v320_v63 = vld [vmem:[%s2732_s8] sm:$0xf] }
 0x122   :  { %v418_v1 = vsel %vm396_vm10, %v320_v63, 0 }
 0x123   :  { %1766 = vmatmul.msk.bf16.vlgmr.msra.gmra.mxu0 %vm77_vm0, %v144_v3  ;;  %1767 = vmatmul.msk.bf16.vlgmr.msra.gmra.mxu1 %vm77_vm0, %v144_v3 }
 0x1a0   :  { %v182_v8 = vpop.f32.mrf.mxu0  ;;  %v196_v9 = vpop.f32.mrf.mxu1 }
 0x1a1   :  { %v183_v11 = vadd.f32 %v182_v8, %v146_v5  ;;  %v197_v18 = vadd.f32 %v196_v9, %v147_v13 }
 0x1a3   :  { %v239_v12 = vmul.f32 %v2288_v6, %v183_v11  ;;  %v231_v26 = vmul.f32 %v2290_v7, %v183_v11  ;;  %v201_v40 = vmul.f32 %v183_v11, %v2252_v36  ;;  %v2330_v36 = vld [vmem:[%s2765_s22 + $0x8] sm:$0xff] }
 0x1a5   :  { %243 = vrot.lane.b32.xlu2 %v239_v12, %s2084_s1 }
 0x1a8   :  { %v184_v16 = vpop.f32.mrf.mxu0  ;;  %v198_v17 = vpop.f32.mrf.mxu1 }
 0x1a9   :  { %v185_v19 = vadd.f32 %v184_v16, %v146_v5  ;;  %v199_v20 = vadd.f32 %v198_v17, %v147_v13 }
 0x1ab   :  { %v2298_v21 = vpack.c.bf16 %v199_v20, %v197_v18  ;;  %v240_v22 = vmul.f32 %v2294_v14, %v185_v19  ;;  %v212_v23 = vmul.f32 %v2296_v15, %v185_v19  ;;  %v232_v27 = vmul.f32 %v2307_v25, %v185_v19 }
 0x1ad   :  { %312 = vmatpush.bf16.msra.mxu3 %v2298_v21  ;;  %245 = vrot.lane.b32.xlu2 %v240_v22, %s2084_s1 }
 0x1ae   :  { %217 = vrot.lane.b32.xlu0 %v212_v23, %s2084_s1 }
 0x1b5   :  { %205 = vrot.lane.b32.xlu2 %v2266_v39, %s2085_s24  ;;  %v202_v39 = vmul.f32 %v185_v19, %v2257_v37 }
 0x1ff   :  { %v244_v24 = vpop.permute.xlu2 %243 }
 0x200   :  { %v249_v29 = vadd.f32 %v244_v24, %v231_v26 }
 0x207   :  { %v246_v28 = vpop.permute.xlu2 %245 }
 0x208   :  { %v250_v30 = vadd.f32 %v246_v28, %v232_v27 }
 0x20a   :  { %v252_v31 = vpack.c.bf16 %v250_v30, %v249_v29 }
 0x20c   :  { %255 = vrot.lane.b32.xlu2 %v252_v31, %s2083_s29 }
 0x20f   :  { %v2312_v32 = vpop.permute.xlu2 %205 }
 0x210   :  { %v211_v33 = vmul.f32 %v2312_v32, %v183_v11 }
 0x212   :  { %215 = vrot.lane.b32.xlu1 %v211_v33, %s2084_s1 }
 0x220   :  { %v218_v38 = vpop.permute.xlu0 %217 }
 0x221   :  { %v222_v42 = vadd.f32 %v218_v38, %v202_v39 }
 0x266   :  { %v256_v34 = vpop.permute.xlu2 %255 }
 0x267   :  { %v262_v35 = vsel %vm257_vm8, %v256_v34, 0 }
 0x268   :  { %271 = vmatpush.bf16.xpose.msra.mxu2 %v262_v35 }
 0x270   :  { %427 = vmatpush.bf16.msrb.mxu2 %v418_v1 }
 0x284   :  { %v216_v41 = vpop.permute.xlu1 %215 }
 0x285   :  { %v221_v43 = vadd.f32 %v216_v41, %v201_v40 }
 0x287   :  { %v251_v44 = vpack.c.bf16 %v222_v42, %v221_v43 }
 0x289   :  { %1768 = vmatmul.msk.bf16.vlgmr.msra.gmra.mxu2 %vm257_vm8, %v251_v44 }
 0x30c   :  { %v273_v46 = vpop.f32.mrf.mxu2 }
 0x30d   :  { %v274_v47 = vadd.f32 %v273_v46, %v2323_v45 }
 0x30f   :  { %v279_v48 = vsel %vm278_vm9, %v274_v47, -inf }
 0x310   :  { %280 = vmax.xlane.f32.xlu2 %v279_v48 }
 0x314   :  { %v275_v37 = vpop.f32.mrf.mxu2 }
 0x315   :  { %v276_v49 = vadd.f32 %v275_v37, %v2330_v36 }
 0x317   :  { %v282_v50 = vsel %vm278_vm9, %v276_v49, -inf }
 0x318   :  { %283 = vmax.xlane.f32.xlu1 %v282_v50 }
 0x331   :  { %324 = vrot.lane.b32.xlu1 %v252_v31, %s2086_s2 }
 0x339   :  { %526 = vrot.lane.b32.xlu1 %v251_v44, %s2751_s25 }
 0x383   :  { %v281_v51 = vpop.xlane.xlu2 %280 }
 0x384   :  { %v285_v52 = vsub.f32 %v274_v47, %v281_v51 }
 0x386   :  { %v287_v53 = vmul.f32 1.442695, %v285_v52 }
 0x388   :  { %1962 = vpow2.f32 %v287_v53 }
 0x38b   :  { %v284_v54 = vpop.xlane.xlu1 %283 }
 0x38c   :  { %v286_v55 = vsub.f32 %v276_v49, %v284_v54 }
 0x38e   :  { %v1963_v56 = vpop.eup %1962  ;;  %v289_v57 = vmul.f32 1.442695, %v286_v55 }
 0x38f   :  { %v291_v58 = vsel %vm278_vm9, %v1963_v56, 0.0 }
 0x390   :  { %1964 = vpow2.f32 %v289_v57  ;;  %292 = vadd.xlane.f32.xlu0 %v291_v58 }
 0x396   :  { %v1965_v59 = vpop.eup %1964 }
 0x397   :  { %v294_v60 = vsel %vm278_vm9, %v1965_v59, 0.0 }
 0x398   :  { %295 = vadd.xlane.f32.xlu2 %v294_v60 }
 0x3a3   :  { %v325_v61 = vpop.permute.xlu1 %324 }
 0x3a4   :  { %322 = vrot.lane.b32.xlu0 %v251_v44, %s2754_s26  ;;  %v330_v62 = vsel %vm257_vm8, %v325_v61, 0 }
 0x3a5   :  { %339 = vmatpush.bf16.xpose.msrb.mxu3 %v330_v62 }
 0x3ac   :  { %436 = vrot.lane.b32.xlu0 %v252_v31, %s2750_s28 }
 0x3b0   :  { %528 = vrot.lane.b32.xlu2 %v252_v31, %s2753_s4  ;;  %v527_v31 = vpop.permute.xlu1 %526 }
 0x3b8   :  { %434 = vrot.lane.b32.xlu2 %v251_v44, %s2091_s30 }
 0x403   :  { %v293_v3 = vpop.xlane.xlu0 %292 }
 0x404   :  { %1966 = vrcp.f32 %v293_v3 }
 0x40a   :  { %v1967_v5 = vpop.eup %1966 }
 0x40b   :  { %v296_v4 = vpop.xlane.xlu2 %295  ;;  %v299_v11 = vmul.f32 %v1967_v5, %v1963_v56 }
 0x40c   :  { %1968 = vrcp.f32 %v296_v4 }
 0x412   :  { %v1969_v8 = vpop.eup %1968 }
 0x413   :  { %v529_v9 = vpop.permute.xlu2 %528  ;;  %v300_v12 = vmul.f32 %v1969_v8, %v1965_v59 }
 0x414   :  { %v534_v13 = vsel %vm257_vm8, %v529_v9, 0 }
 0x415   :  { %543 = vmatpush.bf16.xpose.msra.mxu2 %v534_v13  ;;  %v301_v16 = vpack.c.bf16 %v300_v12, %v299_v11 }
 0x416   :  { %v323_v17 = vpop.permute.xlu0 %322 }
 0x417   :  { %1769 = vmatmul.msk.bf16.vlgmr.msra.gmra.mxu3 %vm278_vm9, %v301_v16 }
 0x41b   :  { %v435_v20 = vpop.permute.xlu2 %434 }
 0x41e   :  { %v437_v18 = vpop.permute.xlu0 %436 }
 0x41f   :  { %v442_v19 = vsel %vm257_vm8, %v437_v18, 0 }
 0x420   :  { %451 = vmatpush.bf16.xpose.msra.mxu3 %v442_v19 }
 0x427   :  { %1770 = vmatmul.msk.bf16.vlgmr.msrb.gmra.mxu3 %vm257_vm8, %v323_v17 }
 0x437   :  { %1775 = vmatmul.msk.bf16.vlgmr.msra.gmra.mxu3 %vm257_vm8, %v435_v20 }
 0x49a   :  { %v314_v22 = vpop.f32.mrf.mxu3 }
 0x4a2   :  { %v316_v23 = vpop.f32.mrf.mxu3 }
 0x4a3   :  { %v319_v24 = vpack.c.bf16 %v316_v23, %v314_v22 }
 0x4a5   :  { %1774 = vmatmul.msk.bf16.vlgmr.msrb.gmra.mxu2 %vm257_vm8, %v319_v24 }
 0x4aa   :  { %v341_v26 = vpop.f32.mrf.mxu3 }
 0x4ab   :  { %v342_v27 = vadd.f32 %v341_v26, %v2323_v45 }
 0x4ad   :  { %v346_v28 = vsel %vm278_vm9, %v342_v27, -inf }
 0x4ae   :  { %347 = vmax.xlane.f32.xlu0 %v346_v28 }
 0x4b2   :  { %v343_v29 = vpop.f32.mrf.mxu3 }
 0x4b3   :  { %v344_v30 = vadd.f32 %v343_v29, %v2330_v36 }
 0x4b5   :  { %1779 = vmatmul.msk.bf16.vlgmr.msra.gmra.mxu2 %vm257_vm8, %v527_v31  ;;  %v349_v33 = vsel %vm278_vm9, %v344_v30, -inf }
 0x4b6   :  { %350 = vmax.xlane.f32.xlu1 %v349_v33 }
 0x4ba   :  { %v453_v34 = vpop.f32.mrf.mxu3 }
 0x4bb   :  { %v454_v35 = vadd.f32 %v453_v34, %v2323_v45  ;;  %v1772_v34 = vld [vmem:[%s2732_s8 + $0x4] sm:$0xf] }
 0x4bd   :  { %v458_v38 = vsel %vm278_vm9, %v454_v35, -inf }
 0x4be   :  { %459 = vmax.xlane.f32.xlu1 %v458_v38 }
 0x4c2   :  { %v455_v51 = vpop.f32.mrf.mxu3 }
 0x4c3   :  { %v456_v53 = vadd.f32 %v455_v51, %v2330_v36 }
 0x4c5   :  { %v461_v59 = vsel %vm278_vm9, %v456_v53, -inf }
 0x521   :  { %v348_v47 = vpop.xlane.xlu0 %347 }
 0x522   :  { %v352_v49 = vsub.f32 %v342_v27, %v348_v47 }
 0x524   :  { %v354_v52 = vmul.f32 1.442695, %v352_v49 }
 0x528   :  { %v2360_v39 = vpop.f32.mrf.mxu2 }
 0x529   :  { %v351_v40 = vpop.xlane.xlu1 %350 }
 0x52a   :  { %v353_v41 = vsub.f32 %v344_v30, %v351_v40 }
 0x52c   :  { %v356_v42 = vmul.f32 1.442695, %v353_v41 }
 0x52e   :  { %1970 = vpow2.f32 %v356_v42 }
 0x52f   :  { %1972 = vpow2.f32 %v354_v52 }
 0x530   :  { %v2362_v43 = vpop.f32.mrf.mxu2 }
 0x531   :  { %v460_v54 = vpop.xlane.xlu1 %459 }
 0x532   :  { %v464_v57 = vsub.f32 %v454_v35, %v460_v54  ;;  %v398_v35 = vsel %vm396_vm10, %v1772_v34, 0 }
 0x533   :  { %407 = vmatpush.bf16.msrb.mxu1 %v398_v35 }
 0x534   :  { %v1971_v44 = vpop.eup %1970  ;;  %v466_v60 = vmul.f32 1.442695, %v464_v57 }
 0x535   :  { %v361_v46 = vsel %vm278_vm9, %v1971_v44, 0.0  ;;  %v1973_v61 = vpop.eup %1972 }
 0x536   :  { %362 = vadd.xlane.f32.xlu1 %v361_v46  ;;  %1974 = vpow2.f32 %v466_v60  ;;  %v358_v62 = vsel %vm278_vm9, %v1973_v61, 0.0  ;;  %v1777_v60 = vld [vmem:[%s2732_s8 + $0x8] sm:$0xf] }
 0x538   :  { %v545_v48 = vpop.f32.mrf.mxu2 }
 0x539   :  { %v546_v37 = vadd.f32 %v545_v48, %v2323_v45 }
 0x53b   :  { %v550_v50 = vsel %vm278_vm9, %v546_v37, -inf }
 0x53c   :  { %551 = vmax.xlane.f32.xlu2 %v550_v50  ;;  %v2372_v63 = vpop.eup %1974 }
 0x53d   :  { %v470_v1 = vsel %vm278_vm9, %v2372_v63, 0.0 }
 0x540   :  { %v547_v55 = vpop.f32.mrf.mxu2 }
 0x541   :  { %v548_v56 = vadd.f32 %v547_v55, %v2330_v36 }
 0x543   :  { %v553_v58 = vsel %vm278_vm9, %v548_v56, -inf }
 0x544   :  { %554 = vmax.xlane.f32.xlu0 %v553_v58  ;;  %462 = vmax.xlane.f32.xlu2 %v461_v59  ;;  %v1781_v58 = vld [vmem:[%s2732_s8 + $0xc] sm:$0xf] }
 0x545   :  { %v600_v59 = vsel %vm396_vm10, %v1781_v58, 0 }
 0x54c   :  { %359 = vadd.xlane.f32.xlu0 %v358_v62 }
 0x554   :  { %471 = vadd.xlane.f32.xlu0 %v470_v1 }
 0x55c   :  { %370 = vrot.lane.b32.xlu2 %v2298_v21, %s2754_s26 }
 0x5a9   :  { %v363_v16 = vpop.xlane.xlu1 %362 }
 0x5af   :  { %v552_v3 = vpop.xlane.xlu2 %551 }
 0x5b0   :  { %v556_v4 = vsub.f32 %v546_v37, %v552_v3 }
 0x5b2   :  { %v558_v5 = vmul.f32 1.442695, %v556_v4 }
 0x5b4   :  { %1976 = vpow2.f32 %v558_v5 }
 0x5b7   :  { %v555_v8 = vpop.xlane.xlu0 %554  ;;  %v463_v9 = vpop.xlane.xlu2 %462 }
 0x5b8   :  { %v465_v11 = vsub.f32 %v456_v53, %v463_v9  ;;  %v557_v17 = vsub.f32 %v548_v56, %v555_v8 }
 0x5ba   :  { %v1977_v12 = vpop.eup %1976  ;;  %v468_v13 = vmul.f32 1.442695, %v465_v11  ;;  %v560_v19 = vmul.f32 1.442695, %v557_v17 }
 0x5bb   :  { %v562_v18 = vsel %vm278_vm9, %v1977_v12, 0.0 }
 0x5bc   :  { %563 = vadd.xlane.f32.xlu0 %v562_v18  ;;  %1978 = vpow2.f32 %v468_v13  ;;  %v1941_v18 = vld [vmem:[%s2733_s9] ss:$0 sm:$0xff] }
 0x5bd   :  { %1980 = vrcp.f32 %v363_v16 }
 0x5bf   :  { %v360_v20 = vpop.xlane.xlu0 %359  ;;  %v371_v22 = vpop.permute.xlu2 %370 }
 0x5c0   :  { %1982 = vrcp.f32 %v360_v20  ;;  %383 = vmatpush.bf16.msrb.mxu0 %v371_v22 }
 0x5c1   :  { %1984 = vpow2.f32 %v560_v19 }
 0x5c2   :  { %v1979_v23 = vpop.eup %1978 }
 0x5c3   :  { %v1981_v24 = vpop.eup %1980  ;;  %v473_v26 = vsel %vm278_vm9, %v1979_v23, 0.0 }
 0x5c4   :  { %474 = vadd.xlane.f32.xlu1 %v473_v26  ;;  %v367_v28 = vmul.f32 %v1981_v24, %v1971_v44 }
 0x5c6   :  { %v1983_v27 = vpop.eup %1982 }
 0x5c7   :  { %v366_v29 = vmul.f32 %v1983_v27, %v1973_v61  ;;  %v1985_v30 = vpop.eup %1984  ;;  %v472_v38 = vpop.xlane.xlu0 %471  ;;  %v508_v61 = vsel %vm396_vm10, %v1777_v60, 0 }
 0x5c8   :  { %v565_v33 = vsel %vm278_vm9, %v1985_v30, 0.0  ;;  %517 = vmatpush.bf16.msra.mxu1 %v508_v61 }
 0x5c9   :  { %v368_v31 = vpack.c.bf16 %v367_v28, %v366_v29 }
 0x5cb   :  { %1771 = vmatmul.msk.bf16.vlgmr.msrb.gmra.mxu0 %vm278_vm9, %v368_v31 }
 0x5cc   :  { %566 = vadd.xlane.f32.xlu1 %v565_v33 }
 0x5d0   :  { %573 = vrot.lane.b32.xlu0 %v2298_v21, %s2751_s25 }
 0x5e5   :  { %481 = vrot.lane.b32.xlu1 %v2298_v21, %s2091_s30 }
 0x62f   :  { %v564_v41 = vpop.xlane.xlu0 %563 }
 0x630   :  { %1986 = vrcp.f32 %v564_v41 }
 0x636   :  { %v1987_v46 = vpop.eup %1986 }
 0x637   :  { %v475_v40 = vpop.xlane.xlu1 %474  ;;  %v570_v48 = vmul.f32 %v1987_v46, %v1977_v12 }
 0x63f   :  { %v567_v42 = vpop.xlane.xlu1 %566 }
 0x640   :  { %1988 = vrcp.f32 %v567_v42  ;;  %v1911_v42 = vld [vmem:[%s2736_s12 + $0x8] sm:$0xff] }
 0x641   :  { %1990 = vrcp.f32 %v475_v40 }
 0x642   :  { %v574_v44 = vpop.permute.xlu0 %573  ;;  %1992 = vrcp.f32 %v472_v38 }
 0x643   :  { %586 = vmatpush.bf16.msrb.mxu3 %v574_v44 }
 0x646   :  { %v1989_v47 = vpop.eup %1988 }
 0x647   :  { %v571_v37 = vmul.f32 %v1989_v47, %v1985_v30  ;;  %v1991_v52 = vpop.eup %1990  ;;  %v1910_v47 = vld [vmem:[%s2736_s12] sm:$0xff] }
 0x648   :  { %v385_v21 = vpop.f32.mrf.mxu0  ;;  %v1993_v53 = vpop.eup %1992  ;;  %v479_v54 = vmul.f32 %v1991_v52, %v1979_v23 }
 0x649   :  { %v572_v49 = vpack.c.bf16 %v571_v37, %v570_v48  ;;  %v478_v55 = vmul.f32 %v1993_v53, %v2372_v63 }
 0x64b   :  { %1780 = vmatmul.msk.bf16.vlgmr.msrb.gmra.mxu3 %vm278_vm9, %v572_v49  ;;  %v480_v57 = vpack.c.bf16 %v479_v54, %v478_v55 }
 0x650   :  { %v387_v50 = vpop.f32.mrf.mxu0 }
 0x651   :  { %v390_v51 = vpack.c.bf16 %v387_v50, %v385_v21 }
 0x653   :  { %1773 = vmatmul.msk.bf16.vlgmr.msrb.gmra.mxu1 %vm257_vm8, %v390_v51 }
 0x654   :  { %712 = vmatpush.bf16.msrb.mxu1 %v1911_v42 }
 0x657   :  { %v482_v56 = vpop.permute.xlu1 %481 }
 0x658   :  { %494 = vmatpush.bf16.msra.mxu0 %v482_v56  ;;  %713 = vmatpush.bf16.msrb.mxu1 %v1910_v47 }
 0x65b   :  { %1776 = vmatmul.msk.bf16.vlgmr.msra.gmra.mxu0 %vm278_vm9, %v480_v57 }
 0x65c   :  { %609 = vmatpush.bf16.msrb.mxu0 %v600_v59 }
 0x6ce   :  { %v588_v62 = vpop.f32.mrf.mxu3 }
 0x6d0   :  { %v409_v8 = vpop.f32.mrf.mxu1 }
 0x6d1   :  { %v430_v11 = vadd.f32 %v2360_v39, %v409_v8 }
 0x6d6   :  { %v590_v63 = vpop.f32.mrf.mxu3 }
 0x6d7   :  { %v593_v1 = vpack.c.bf16 %v590_v63, %v588_v62  ;;  %v1942_v62 = vld [vmem:[%s2734_s10] ss:$0 sm:$0xff] }
 0x6d8   :  { %v496_v3 = vpop.f32.mrf.mxu0  ;;  %v411_v9 = vpop.f32.mrf.mxu1 }
 0x6d9   :  { %1782 = vmatmul.msk.bf16.vlgmr.msrb.gmra.mxu0 %vm257_vm8, %v593_v1  ;;  %v432_v20 = vadd.f32 %v2362_v43, %v411_v9 }
 0x6e0   :  { %v498_v4 = vpop.f32.mrf.mxu0 }
 0x6e1   :  { %v501_v5 = vpack.c.bf16 %v498_v4, %v496_v3  ;;  %v1943_v4 = vld [vmem:[%s2735_s11] ss:$0 sm:$0xff] }
 0x6e3   :  { %1778 = vmatmul.msk.bf16.vlgmr.msra.gmra.mxu1 %vm257_vm8, %v501_v5 }
 0x756   :  { %v611_v12 = vpop.f32.mrf.mxu0 }
 0x75e   :  { %v613_v39 = vpop.f32.mrf.mxu0 }
 0x760   :  { %v519_v13 = vpop.f32.mrf.mxu1 }
 0x761   :  { %v524_v16 = vadd.f32 %v519_v13, %v430_v11 }
 0x763   :  { %v616_v17 = vadd.f32 %v611_v12, %v524_v16  ;;  %v1944_v16 = vld [vmem:[%s2737_s13] ss:$0 sm:$0xff] }
 0x765   :  { %v618_v19 = vadd.f32 %v616_v17, %v2201_v0 }
 0x767   :  { %v2410_v22 = vadd.f32 %v1941_v18, %v618_v19 }
 0x768   :  { %v521_v23 = vpop.f32.mrf.mxu1 }
 0x769   :  { %v525_v24 = vadd.f32 %v521_v23, %v432_v20  ;;  %v628_v26 = vsel %vm77_vm0, %v2410_v22, 0.0 }
 0x76a   :  { %629 = vadd.xlane.f32.xlu2 %v628_v26 }
 0x76b   :  { %v617_v27 = vadd.f32 %v613_v39, %v525_v24 }
 0x76d   :  { %v619_v28 = vadd.f32 %v617_v27, %v2208_v2 }
 0x76f   :  { %v2415_v29 = vadd.f32 %v1941_v18, %v619_v28 }
 0x771   :  { %v631_v30 = vsel %vm77_vm0, %v2415_v29, 0.0 }
 0x772   :  { %632 = vadd.xlane.f32.xlu0 %v631_v30 }
 0x7dd   :  { %v630_v0 = vpop.xlane.xlu2 %629 }
 0x7de   :  { %v634_v43 = vmul.f32 %v630_v0, %v2212_v10 }
 0x7e0   :  { %v636_v31 = vsub.f32 %v2410_v22, %v634_v43 }
 0x7e2   :  { %v638_v33 = vmul.f32 %v636_v31, %v636_v31 }
 0x7e4   :  { %v640_v34 = vsel %vm77_vm0, %v638_v33, 0.0 }
 0x7e5   :  { %641 = vadd.xlane.f32.xlu1 %v640_v34  ;;  %v633_v35 = vpop.xlane.xlu0 %632 }
 0x7e6   :  { %v635_v38 = vmul.f32 %v633_v35, %v2212_v10 }
 0x7e8   :  { %v637_v2 = vsub.f32 %v2415_v29, %v635_v38 }
 0x7ea   :  { %v639_v40 = vmul.f32 %v637_v2, %v637_v2 }
 0x7ec   :  { %v643_v41 = vsel %vm77_vm0, %v639_v40, 0.0 }
 0x7ed   :  { %644 = vadd.xlane.f32.xlu2 %v643_v41 }
 0x858   :  { %v642_v44 = vpop.xlane.xlu1 %641 }
 0x859   :  { %v646_v46 = vmul.f32 %v642_v44, %v2212_v10 }
 0x85b   :  { %v648_v48 = vadd.f32 1e-05, %v646_v46 }
 0x85d   :  { %1994 = vrsqrt.f32 %v648_v48  ;;  %vm656_vm12 = vweird.f32 %v648_v48 }
 0x860   :  { %v645_v37 = vpop.xlane.xlu2 %644 }
 0x861   :  { %v647_v21 = vmul.f32 %v645_v37, %v2212_v10  ;;  %v1914_v37 = vld [vmem:[%s2738_s14 + $0x10] sm:$0xff] }
 0x863   :  { %v1995_v49 = vpop.eup %1994  ;;  %v649_v50 = vadd.f32 1e-05, %v647_v21 }
 0x864   :  { %v651_v51 = vmul.f32 %v1995_v49, %v648_v48  ;;  %vm657_vm11 = vweird.f32 %v1995_v49 }
 0x865   :  { %1996 = vrsqrt.f32 %v649_v50  ;;  %vm658_vm13 = vmor %vm656_vm12, %vm657_vm11  ;;  %vm666_vm15 = vweird.f32 %v649_v50 }
 0x866   :  { %v652_v52 = vmul.f32 %v1995_v49, %v651_v51 }
 0x868   :  { %v653_v53 = vmul.f32 0.5, %v652_v52 }
 0x86a   :  { %v654_v54 = vsub.f32 1.5, %v653_v53 }
 0x86b   :  { %v1997_v55 = vpop.eup %1996 }
 0x86c   :  { %v655_v56 = vmul.f32 %v1995_v49, %v654_v54  ;;  %v661_v57 = vmul.f32 %v1997_v55, %v649_v50  ;;  %vm667_vm14 = vweird.f32 %v1997_v55 }
 0x86d   :  { %vm668_vm1 = vmor %vm666_vm15, %vm667_vm14 }
 0x86e   :  { %v662_v58 = vmul.f32 %v1997_v55, %v661_v57  ;;  %v659_v59 = vsel %vm658_vm13, %v1995_v49, %v655_v56  ;;  %vm845_vm13 = vcmask 523264  }
 0x86f   :  { %v670_v63 = vmul.f32 %v659_v59, %v636_v31 }
 0x870   :  { %v663_v60 = vmul.f32 0.5, %v662_v58 }
 0x871   :  { %v675_v5 = vmul.f32 %v1942_v62, %v670_v63 }
 0x872   :  { %v664_v61 = vsub.f32 1.5, %v663_v60 }
 0x873   :  { %v680_v11 = vadd.f32 %v1943_v4, %v675_v5 }
 0x874   :  { %v665_v1 = vmul.f32 %v1997_v55, %v664_v61  ;;  %v1912_v61 = vld [vmem:[%s2738_s14] sm:$0xff] }
 0x876   :  { %v669_v3 = vsel %vm668_vm1, %v1997_v55, %v665_v1  ;;  %v1913_v55 = vld [vmem:[%s2738_s14 + $0x8] sm:$0xff] }
 0x877   :  { %v671_v8 = vmul.f32 %v669_v3, %v637_v2  ;;  %v1915_v2 = vld [vmem:[%s2738_s14 + $0x18] sm:$0xff] }
 0x878   :  { %853 = vmatpush.bf16.msrb.mxu2 %v1915_v2 }
 0x879   :  { %v676_v9 = vmul.f32 %v1942_v62, %v671_v8 }
 0x87b   :  { %v681_v12 = vadd.f32 %v1943_v4, %v676_v9 }
 0x87c   :  { %854 = vmatpush.bf16.msrb.mxu2 %v1914_v37 }
 0x87d   :  { %v687_v13 = vpack.c.bf16 %v681_v12, %v680_v11 }
 0x87f   :  { %1791 = vmatmul.msk.bf16.vlgmr.msrb.gmra.mxu1 %vm77_vm0, %v687_v13 }
 0x880   :  { %855 = vmatpush.bf16.msrb.mxu2 %v1913_v55 }
 0x884   :  { %856 = vmatpush.bf16.msrb.mxu2 %v1912_v61 }
 0x8fc   :  { %v715_v17 = vpop.f32.mrf.mxu1 }
 0x8fd   :  { %v2443_v18 = vadd.f32 %v1944_v16, %v715_v17 }
 0x8ff   :  { %v2446_v19 = vmul.f32 0.70710677, %v2443_v18 }
 0x901   :  { %v724_v20 = vmul.f32 %v2446_v19, %v2446_v19 }
 0x903   :  { %v725_v23 = vmin.f32 %v724_v20, 16.0 }
 0x904   :  { %v717_v24 = vpop.f32.mrf.mxu1 }
 0x905   :  { %v726_v26 = vmul.f32 2.1237322e-06, %v725_v23  ;;  %v737_v39 = vmul.f32 3.8918573e-05, %v725_v23  ;;  %v2450_v27 = vadd.f32 %v1944_v16, %v717_v24 }
 0x907   :  { %v727_v28 = vadd.f32 0.00028619796, %v726_v26  ;;  %v738_v30 = vadd.f32 0.001143296, %v737_v39  ;;  %v2453_v0 = vmul.f32 0.70710677, %v2450_v27 }
 0x909   :  { %v739_v43 = vmul.f32 %v738_v30, %v725_v23  ;;  %v764_v31 = vmul.f32 %v2453_v0, %v2453_v0  ;;  %v728_v33 = vmul.f32 %v727_v28, %v725_v23 }
 0x90b   :  { %v740_v34 = vadd.f32 0.014752088, %v739_v43  ;;  %v765_v35 = vmin.f32 %v764_v31, 16.0  ;;  %v729_v42 = vadd.f32 0.0036580483, %v728_v33 }
 0x90d   :  { %v741_v38 = vmul.f32 %v740_v34, %v725_v23  ;;  %v766_v40 = vmul.f32 2.1237322e-06, %v765_v35  ;;  %v777_v41 = vmul.f32 3.8918573e-05, %v765_v35  ;;  %v730_v50 = vmul.f32 %v729_v42, %v725_v23 }
 0x90f   :  { %v742_v44 = vadd.f32 0.112945676, %v741_v38  ;;  %v767_v46 = vadd.f32 0.00028619796, %v766_v40  ;;  %v778_v47 = vadd.f32 0.001143296, %v777_v41 }
 0x910   :  { %v731_v57 = vadd.f32 0.05243302, %v730_v50 }
 0x911   :  { %v743_v48 = vmul.f32 %v742_v44, %v725_v23  ;;  %v768_v21 = vmul.f32 %v767_v46, %v765_v35  ;;  %v779_v49 = vmul.f32 %v778_v47, %v765_v35 }
 0x912   :  { %v732_v63 = vmul.f32 %v731_v57, %v725_v23 }
 0x913   :  { %v744_v51 = vadd.f32 0.4994258, %v743_v48  ;;  %v769_v52 = vadd.f32 0.0036580483, %v768_v21  ;;  %v780_v53 = vadd.f32 0.014752088, %v779_v49 }
 0x914   :  { %v733_v8 = vadd.f32 0.18741608, %v732_v63 }
 0x915   :  { %v745_v54 = vmul.f32 %v744_v51, %v725_v23  ;;  %v781_v56 = vmul.f32 %v780_v53, %v765_v35  ;;  %v770_v59 = vmul.f32 %v769_v52, %v765_v35  ;;  %v720_v52 = vmul.f32 0.5, %v2443_v18 }
 0x916   :  { %v734_v16 = vmul.f32 %v733_v8, %v725_v23  ;;  %v721_v53 = vmul.f32 0.5, %v2450_v27 }
 0x917   :  { %v746_v58 = vadd.f32 1.0, %v745_v54  ;;  %v782_v60 = vadd.f32 0.112945676, %v781_v56  ;;  %v771_v1 = vadd.f32 0.05243302, %v770_v59 }
 0x918   :  { %v735_v28 = vadd.f32 1.1283791, %v734_v16  ;;  %v1919_v16 = vld [vmem:[%s2730_s6 + $0x34] sm:$0xf0] }
 0x919   :  { %1998 = vrcp.f32 %v746_v58  ;;  %v783_v62 = vmul.f32 %v782_v60, %v765_v35  ;;  %v772_v11 = vmul.f32 %v771_v1, %v765_v35  ;;  %v758_v20 = vand.u32 2147483648, %v746_v58 }
 0x91a   :  { %v756_v26 = vand.u32 2147483647, %v746_v58  ;;  %vm752_vm3 = vweird.f32 %v746_v58  ;;  %v736_v2 = vmul.f32 %v735_v28, %v2446_v19 }
 0x91b   :  { %v784_v3 = vadd.f32 0.4994258, %v783_v62  ;;  %v773_v24 = vadd.f32 0.18741608, %v772_v11  ;;  %v759_v31 = vor.u32 1.1754944e-38, %v758_v20 }
 0x91c   :  { %vm757_vm5 = vcmp.eq.f32.partialorder %v756_v26, 8.507059e+37 }
 0x91d   :  { %v785_v4 = vmul.f32 %v784_v3, %v765_v35  ;;  %v774_v33 = vmul.f32 %v773_v24, %v765_v35  ;;  %v1830_v24 = vld [vmem:[%s2730_s6 + $0x38] sm:$0xf0] }
 0x91f   :  { %v1999_v5 = vpop.eup %1998  ;;  %v786_v12 = vadd.f32 1.0, %v785_v4  ;;  %v775_v23 = vadd.f32 1.1283791, %v774_v33 }
 0x920   :  { %v748_v9 = vmul.f32 %v1999_v5, %v746_v58  ;;  %vm753_vm2 = vweird.f32 %v1999_v5 }
 0x921   :  { %2000 = vrcp.f32 %v786_v12  ;;  %vm754_vm4 = vmor %vm752_vm3, %vm753_vm2  ;;  %v798_v41 = vand.u32 2147483648, %v786_v12  ;;  %v796_v46 = vand.u32 2147483647, %v786_v12  ;;  %vm792_vm7 = vweird.f32 %v786_v12 }
 0x922   :  { %v749_v13 = vsub.f32 1.0, %v748_v9  ;;  %v776_v21 = vmul.f32 %v775_v23, %v2453_v0  ;;  %v1945_v0 = vld [vmem:[%s2739_s15] ss:$0 sm:$0xff] }
 0x923   :  { %v799_v48 = vor.u32 1.1754944e-38, %v798_v41  ;;  %vm797_vm12 = vcmp.eq.f32.partialorder %v796_v46, 8.507059e+37 }
 0x924   :  { %v750_v17 = vmul.f32 %v1999_v5, %v749_v13  ;;  %v1828_v13 = vld [vmem:[%s2730_s6 + $0x30] sm:$0xf] }
 0x925   :  { %v1829_v20 = vor.u32 %v1919_v16, %v1828_v13 }
 0x926   :  { %v751_v39 = vadd.f32 %v1999_v5, %v750_v17  ;;  %v1918_v17 = vld [vmem:[%s2730_s6 + $0x34] sm:$0xf] }
 0x927   :  { %v2001_v30 = vpop.eup %2000  ;;  %965 = vmatpush.bf16.msra.mxu3 %v1829_v20 }
 0x928   :  { %v755_v43 = vsel %vm754_vm4, %v1999_v5, %v751_v39  ;;  %v788_v34 = vmul.f32 %v2001_v30, %v786_v12  ;;  %vm793_vm6 = vweird.f32 %v2001_v30  ;;  %v1833_v39 = vor.u32 %v1918_v17, %v1830_v24 }
 0x929   :  { %v760_v38 = vsel %vm757_vm5, %v759_v31, %v755_v43  ;;  %vm794_vm11 = vmor %vm792_vm7, %vm793_vm6  ;;  %v1917_v43 = vld [vmem:[%s2730_s6 + $0x24] sm:$0xf0]  ;;  %v1916_v31 = vld [vmem:[%s2730_s6 + $0x24] sm:$0xf] }
 0x92a   :  { %v789_v40 = vsub.f32 1.0, %v788_v34  ;;  %v761_v42 = vmul.f32 %v760_v38, %v736_v2  ;;  %979 = vmatpush.bf16.msra.mxu0 %v1833_v39  ;;  %v1822_v38 = vld [vmem:[%s2730_s6 + $0x28] sm:$0xf0] }
 0x92b   :  { %v1825_v2 = vor.u32 %v1916_v31, %v1822_v38 }
 0x92c   :  { %v790_v44 = vmul.f32 %v2001_v30, %v789_v40  ;;  %v1792_v37 = vclamps-f32 %v761_v42, 1.0 }
 0x92e   :  { %v791_v47 = vadd.f32 %v2001_v30, %v790_v44  ;;  %v804_v51 = vadd.f32 1.0, %v1792_v37  ;;  %980 = vmatpush.bf16.msra.mxu0 %v1825_v2 }
 0x930   :  { %v795_v35 = vsel %vm794_vm11, %v2001_v30, %v791_v47  ;;  %v806_v55 = vmul.f32 %v804_v51, %v720_v52  ;;  %v1820_v30 = vld [vmem:[%s2730_s6 + $0x20] sm:$0xf] }
 0x931   :  { %v800_v49 = vsel %vm797_vm12, %v799_v48, %v795_v35  ;;  %v1821_v34 = vor.u32 %v1917_v43, %v1820_v30  ;;  %v1946_v52 = vld [vmem:[%s2764_s3 + $0x1] ss:$0 sm:$0xff] }
 0x932   :  { %v801_v50 = vmul.f32 %v800_v49, %v776_v21 }
 0x933   :  { %966 = vmatpush.bf16.msra.mxu3 %v1821_v34 }
 0x934   :  { %v1793_v19 = vclamps-f32 %v801_v50, 1.0 }
 0x936   :  { %v805_v54 = vadd.f32 1.0, %v1793_v19 }
 0x938   :  { %v807_v56 = vmul.f32 %v805_v54, %v721_v53 }
 0x93a   :  { %v817_v57 = vpack.c.bf16 %v807_v56, %v806_v55  ;;  %v1947_v56 = vld [vmem:[%s2729_s5 + $0x1] ss:$0 sm:$0xff] }
 0x93c   :  { %1810 = vmatmul.msk.bf16.vlgmr.msrb.gmra.mxu2 %vm845_vm13, %v817_v57 }
 0x9bf   :  { %v858_v58 = vpop.f32.mrf.mxu2 }
 0x9c0   :  { %v859_v59 = vadd.f32 %v1945_v0, %v858_v58 }
 0x9c2   :  { %v2478_v60 = vadd.f32 %v859_v59, %v2410_v22 }
 0x9c4   :  { %v869_v18 = vsel %vm77_vm0, %v2478_v60, 0.0 }
 0x9c5   :  { %870 = vadd.xlane.f32.xlu2 %v869_v18 }
 0x9c7   :  { %v860_v27 = vpop.f32.mrf.mxu2 }
 0x9c8   :  { %v861_v61 = vadd.f32 %v1945_v0, %v860_v27 }
 0x9ca   :  { %v2483_v62 = vadd.f32 %v861_v61, %v2415_v29 }
 0x9cc   :  { %v872_v63 = vsel %vm77_vm0, %v2483_v62, 0.0 }
 0x9cd   :  { %873 = vadd.xlane.f32.xlu0 %v872_v63  ;;  %v1817_v63 = vld [vmem:[%s2731_s7 + $0x2] sm:$0x3] }
 0xa38   :  { %v871_v1 = vpop.xlane.xlu2 %870 }
 0xa39   :  { %v875_v3 = vmul.f32 %v871_v1, %v2212_v10  ;;  %v932_v1 = vperm.slane %v1817_v63, 0 }
 0xa3b   :  { %v877_v4 = vsub.f32 %v2478_v60, %v875_v3  ;;  %v933_v3 = vperm.slane %v1817_v63, 1 }
 0xa3d   :  { %v879_v22 = vmul.f32 %v877_v4, %v877_v4 }
 0xa3f   :  { %v881_v5 = vsel %vm77_vm0, %v879_v22, 0.0 }
 0xa40   :  { %v874_v8 = vpop.xlane.xlu0 %873  ;;  %882 = vadd.xlane.f32.xlu2 %v881_v5 }
 0xa41   :  { %v876_v9 = vmul.f32 %v874_v8, %v2212_v10 }
 0xa43   :  { %v878_v11 = vsub.f32 %v2483_v62, %v876_v9 }
 0xa45   :  { %v880_v29 = vmul.f32 %v878_v11, %v878_v11 }
 0xa47   :  { %v884_v12 = vsel %vm77_vm0, %v880_v29, 0.0 }
 0xa48   :  { %885 = vadd.xlane.f32.xlu1 %v884_v12 }
 0xab3   :  { %v883_v26 = vpop.xlane.xlu2 %882 }
 0xab4   :  { %v887_v28 = vmul.f32 %v883_v26, %v2212_v10 }
 0xab6   :  { %v889_v33 = vadd.f32 1e-05, %v887_v28 }
 0xab8   :  { %2002 = vrsqrt.f32 %v889_v33  ;;  %vm897_vm15 = vweird.f32 %v889_v33 }
 0xabb   :  { %v886_v40 = vpop.xlane.xlu1 %885 }
 0xabc   :  { %v888_v23 = vmul.f32 %v886_v40, %v2212_v10 }
 0xabe   :  { %v2003_v41 = vpop.eup %2002  ;;  %v890_v42 = vadd.f32 1e-05, %v888_v23 }
 0xabf   :  { %v892_v44 = vmul.f32 %v2003_v41, %v889_v33  ;;  %vm898_vm14 = vweird.f32 %v2003_v41 }
 0xac0   :  { %2004 = vrsqrt.f32 %v890_v42  ;;  %vm899_vm1 = vmor %vm897_vm15, %vm898_vm14  ;;  %vm907_vm3 = vweird.f32 %v890_v42 }
 0xac1   :  { %v893_v46 = vmul.f32 %v2003_v41, %v892_v44 }
 0xac3   :  { %v894_v47 = vmul.f32 0.5, %v893_v46 }
 0xac5   :  { %v895_v48 = vsub.f32 1.5, %v894_v47 }
 0xac6   :  { %v2005_v37 = vpop.eup %2004 }
 0xac7   :  { %v896_v21 = vmul.f32 %v2003_v41, %v895_v48  ;;  %v902_v35 = vmul.f32 %v2005_v37, %v890_v42  ;;  %vm908_vm2 = vweird.f32 %v2005_v37 }
 0xac8   :  { %vm909_vm4 = vmor %vm907_vm3, %vm908_vm2 }
 0xac9   :  { %v903_v49 = vmul.f32 %v2005_v37, %v902_v35  ;;  %v900_v50 = vsel %vm899_vm1, %v2003_v41, %v896_v21 }
 0xaca   :  { %v911_v53 = vmul.f32 %v900_v50, %v877_v4 }
 0xacb   :  { %v904_v51 = vmul.f32 0.5, %v903_v49 }
 0xacc   :  { %v916_v57 = vmul.f32 %v1946_v52, %v911_v53 }
 0xacd   :  { %v905_v19 = vsub.f32 1.5, %v904_v51 }
 0xace   :  { %v921_v59 = vadd.f32 %v1947_v56, %v916_v57 }
 0xacf   :  { %v906_v54 = vmul.f32 %v2005_v37, %v905_v19 }
 0xad1   :  { %v910_v55 = vsel %vm909_vm4, %v2005_v37, %v906_v54  ;;  %v1838_v54 = vld [vmem:[%s2732_s8 + $0x10] sm:$0xf] }
 0xad2   :  { %v912_v0 = vmul.f32 %v910_v55, %v878_v11  ;;  %v1180_v55 = vsel %vm396_vm10, %v1838_v54, 0 }
 0xad4   :  { %v917_v58 = vmul.f32 %v1946_v52, %v912_v0 }
 0xad6   :  { %v922_v18 = vadd.f32 %v1947_v56, %v917_v58 }
 0xad8   :  { %v930_v27 = vpack.c.bf16 %v922_v18, %v921_v59 }
 0xada   :  { %1834 = vmatmul.msk.bf16.vlgmr.msra.gmra.mxu3 %vm77_vm0, %v930_v27  ;;  %1835 = vmatmul.msk.bf16.vlgmr.msra.gmra.mxu0 %vm77_vm0, %v930_v27 }
 0xb57   :  { %v982_v61 = vpop.f32.mrf.mxu0 }
 0xb58   :  { %v983_v8 = vadd.f32 %v982_v61, %v933_v3 }
 0xb5d   :  { %v968_v4 = vpop.f32.mrf.mxu3 }
 0xb5e   :  { %v969_v22 = vadd.f32 %v968_v4, %v932_v1 }
 0xb5f   :  { %v984_v5 = vpop.f32.mrf.mxu0 }
 0xb60   :  { %v985_v9 = vadd.f32 %v984_v5, %v933_v3  ;;  %v1003_v11 = vmul.f32 %v969_v22, %v2288_v6  ;;  %v989_v17 = vmul.f32 %v969_v22, %v2312_v32  ;;  %v1001_v26 = vmul.f32 %v969_v22, %v2290_v7  ;;  %v2052_v32 = vld [vmem:[%s2762_s27 + $0x8] sm:$0xff] }
 0xb62   :  { %v2531_v29 = vpack.c.bf16 %v985_v9, %v983_v8  ;;  %1007 = vrot.lane.b32.xlu0 %v1003_v11, %s2084_s1  ;;  %v2054_v8 = vld [vmem:[%s2765_s22] sm:$0xff] }
 0xb64   :  { %1074 = vmatpush.bf16.msra.mxu2 %v2531_v29 }
 0xb65   :  { %v970_v12 = vpop.f32.mrf.mxu3 }
 0xb66   :  { %v971_v13 = vadd.f32 %v970_v12, %v932_v1 }
 0xb68   :  { %v1004_v16 = vmul.f32 %v971_v13, %v2294_v14  ;;  %v990_v20 = vmul.f32 %v971_v13, %v2296_v15  ;;  %v1002_v24 = vmul.f32 %v971_v13, %v2307_v25  ;;  %v988_v31 = vmul.f32 %v2052_v32, %v971_v13  ;;  %v2053_v15 = vld [vmem:[%s2762_s27] sm:$0xff]  ;;  %s2766_s27 = smov 120   ;;  %1189 = vmatpush.bf16.msrb.mxu2 %v1180_v55  ;;  %v2055_v13 = vld [vmem:[%s2765_s22 + $0x8] sm:$0xff] }
 0xb69   :  { %v987_v33 = vmul.f32 %v2053_v15, %v969_v22 }
 0xb6a   :  { %1009 = vrot.lane.b32.xlu2 %v1004_v16, %s2084_s1  ;;  %993 = vrot.lane.b32.xlu0 %v989_v17, %s2084_s1 }
 0xb72   :  { %995 = vrot.lane.b32.xlu2 %v990_v20, %s2084_s1  ;;  %s2768_s1 = smov 104  }
 0xbc4   :  { %v1010_v6 = vpop.permute.xlu2 %1009 }
 0xbc5   :  { %v1014_v28 = vadd.f32 %v1010_v6, %v1002_v24 }
 0xbcc   :  { %v996_v14 = vpop.permute.xlu2 %995 }
 0xbcd   :  { %v1000_v34 = vadd.f32 %v996_v14, %v988_v31 }
 0xbd4   :  { %v1008_v39 = vpop.permute.xlu0 %1007 }
 0xbd5   :  { %v1013_v30 = vadd.f32 %v1008_v39, %v1001_v26 }
 0xbd7   :  { %v1016_v43 = vpack.c.bf16 %v1014_v28, %v1013_v30 }
 0xbd9   :  { %1019 = vrot.lane.b32.xlu1 %v1016_v43, %s2083_s29  ;;  %s2767_s29 = smov 40  }
 0xbdc   :  { %v994_v25 = vpop.permute.xlu0 %993 }
 0xbdd   :  { %v999_v7 = vadd.f32 %v994_v25, %v987_v33 }
 0xbdf   :  { %v1015_v38 = vpack.c.bf16 %v1000_v34, %v999_v7 }
 0xc4b   :  { %v1020_v2 = vpop.permute.xlu1 %1019 }
 0xc4c   :  { %v1025_v40 = vsel %vm257_vm8, %v1020_v2, 0 }
 0xc4d   :  { %1034 = vmatpush.bf16.xpose.msra.mxu1 %v1025_v40 }
 0xc54   :  { %1836 = vmatmul.msk.bf16.vlgmr.msra.gmra.mxu1 %vm257_vm8, %v1015_v38 }
 0xcd1   :  { %v1036_v23 = vpop.f32.mrf.mxu1 }
 0xcd2   :  { %v1037_v41 = vadd.f32 %v1036_v23, %v2323_v45 }
 0xcd4   :  { %v1041_v42 = vsel %vm278_vm9, %v1037_v41, -inf }
 0xcd5   :  { %1042 = vmax.xlane.f32.xlu0 %v1041_v42 }
 0xcd9   :  { %v1038_v44 = vpop.f32.mrf.mxu1 }
 0xcda   :  { %v1039_v46 = vadd.f32 %v1038_v44, %v2330_v36 }
 0xcdc   :  { %v1044_v47 = vsel %vm278_vm9, %v1039_v46, -inf }
 0xcdd   :  { %1045 = vmax.xlane.f32.xlu1 %v1044_v47 }
 0xcf6   :  { %1087 = vrot.lane.b32.xlu1 %v1016_v43, %s2086_s2  ;;  %s2769_s2 = smov 48  }
 0xcfe   :  { %1196 = vrot.lane.b32.xlu1 %v1015_v38, %s2091_s30 }
 0xd48   :  { %v1043_v48 = vpop.xlane.xlu0 %1042 }
 0xd49   :  { %v1047_v37 = vsub.f32 %v1037_v41, %v1043_v48 }
 0xd4b   :  { %v1049_v21 = vmul.f32 1.442695, %v1047_v37 }
 0xd4d   :  { %2006 = vpow2.f32 %v1049_v21 }
 0xd50   :  { %v1046_v35 = vpop.xlane.xlu1 %1045 }
 0xd51   :  { %v1048_v49 = vsub.f32 %v1039_v46, %v1046_v35 }
 0xd53   :  { %v2007_v45 = vpop.eup %2006  ;;  %v1051_v50 = vmul.f32 1.442695, %v1048_v49 }
 0xd54   :  { %v1053_v51 = vsel %vm278_vm9, %v2007_v45, 0.0 }
 0xd55   :  { %2008 = vpow2.f32 %v1051_v50  ;;  %1054 = vadd.xlane.f32.xlu2 %v1053_v51 }
 0xd5b   :  { %v2009_v36 = vpop.eup %2008 }
 0xd5c   :  { %v1056_v19 = vsel %vm278_vm9, %v2009_v36, 0.0 }
 0xd5d   :  { %1057 = vadd.xlane.f32.xlu0 %v1056_v19 }
 0xd68   :  { %v1088_v52 = vpop.permute.xlu1 %1087 }
 0xd69   :  { %v1093_v53 = vsel %vm257_vm8, %v1088_v52, 0 }
 0xd6a   :  { %1102 = vmatpush.bf16.xpose.msrb.mxu3 %v1093_v53 }
 0xd6d   :  { %1085 = vrot.lane.b32.xlu2 %v1015_v38, %s2766_s27 }
 0xd70   :  { %v1197_v22 = vpop.permute.xlu1 %1196 }
 0xd71   :  { %1290 = vrot.lane.b32.xlu0 %v1016_v43, %s2767_s29 }
 0xd75   :  { %1288 = vrot.lane.b32.xlu2 %v1015_v38, %s2768_s1 }
 0xd79   :  { %1198 = vrot.lane.b32.xlu0 %v1016_v43, %s2769_s2 }
 0xdc8   :  { %v1055_v56 = vpop.xlane.xlu2 %1054 }
 0xdc9   :  { %2010 = vrcp.f32 %v1055_v56 }
 0xdcf   :  { %v2011_v58 = vpop.eup %2010 }
 0xdd0   :  { %v1086_v57 = vpop.permute.xlu2 %1085  ;;  %v1058_v0 = vpop.xlane.xlu0 %1057  ;;  %v1061_v18 = vmul.f32 %v2011_v58, %v2007_v45 }
 0xdd1   :  { %2012 = vrcp.f32 %v1058_v0  ;;  %1839 = vmatmul.msk.bf16.vlgmr.msrb.gmra.mxu3 %vm257_vm8, %v1086_v57 }
 0xdd7   :  { %v2013_v59 = vpop.eup %2012 }
 0xdd8   :  { %v1062_v27 = vmul.f32 %v2013_v59, %v2009_v36  ;;  %v1289_v28 = vpop.permute.xlu2 %1288 }
 0xdda   :  { %v1063_v61 = vpack.c.bf16 %v1062_v27, %v1061_v18 }
 0xddc   :  { %1837 = vmatmul.msk.bf16.vlgmr.msra.gmra.mxu2 %vm278_vm9, %v1063_v61 }
 0xde3   :  { %v1291_v63 = vpop.permute.xlu0 %1290 }
 0xde4   :  { %v1296_v1 = vsel %vm257_vm8, %v1291_v63, 0 }
 0xde5   :  { %1305 = vmatpush.bf16.xpose.msra.mxu2 %v1296_v1 }
 0xdeb   :  { %v1199_v3 = vpop.permute.xlu0 %1198 }
 0xdec   :  { %v1204_v4 = vsel %vm257_vm8, %v1199_v3, 0 }
 0xded   :  { %1213 = vmatpush.bf16.xpose.msra.mxu3 %v1204_v4 }
 0xdf4   :  { %1844 = vmatmul.msk.bf16.vlgmr.msra.gmra.mxu3 %vm257_vm8, %v1197_v22 }
 0xe54   :  { %v1104_v5 = vpop.f32.mrf.mxu3 }
 0xe55   :  { %v1105_v9 = vadd.f32 %v2054_v8, %v1104_v5 }
 0xe57   :  { %v1109_v11 = vsel %vm278_vm9, %v1105_v9, -inf }
 0xe58   :  { %1110 = vmax.xlane.f32.xlu0 %v1109_v11 }
 0xe5c   :  { %v1106_v12 = vpop.f32.mrf.mxu3 }
 0xe5d   :  { %v1107_v16 = vadd.f32 %v2055_v13, %v1106_v12 }
 0xe5f   :  { %v1076_v17 = vpop.f32.mrf.mxu2  ;;  %v1112_v20 = vsel %vm278_vm9, %v1107_v16, -inf }
 0xe60   :  { %1113 = vmax.xlane.f32.xlu2 %v1112_v20 }
 0xe67   :  { %v1078_v6 = vpop.f32.mrf.mxu2 }
 0xe68   :  { %v1081_v24 = vpack.c.bf16 %v1078_v6, %v1076_v17  ;;  %v1841_v17 = vld [vmem:[%s2732_s8 + $0x14] sm:$0xf] }
 0xe69   :  { %v1160_v6 = vsel %vm396_vm10, %v1841_v17, 0 }
 0xe6a   :  { %1843 = vmatmul.msk.bf16.vlgmr.msrb.gmra.mxu2 %vm257_vm8, %v1081_v24  ;;  %1169 = vmatpush.bf16.msrb.mxu1 %v1160_v6 }
 0xe77   :  { %v1215_v26 = vpop.f32.mrf.mxu3 }
 0xe78   :  { %v1216_v39 = vadd.f32 %v2054_v8, %v1215_v26 }
 0xe7a   :  { %1848 = vmatmul.msk.bf16.vlgmr.msra.gmra.mxu2 %vm257_vm8, %v1289_v28  ;;  %v1220_v30 = vsel %vm278_vm9, %v1216_v39, -inf }
 0xe7b   :  { %1221 = vmax.xlane.f32.xlu0 %v1220_v30 }
 0xe7f   :  { %v1217_v23 = vpop.f32.mrf.mxu3 }
 0xe80   :  { %v1218_v42 = vadd.f32 %v2055_v13, %v1217_v23 }
 0xe82   :  { %v1223_v21 = vsel %vm278_vm9, %v1218_v42, -inf }
 0xecb   :  { %v1111_v34 = vpop.xlane.xlu0 %1110 }
 0xecc   :  { %v1115_v2 = vsub.f32 %v1105_v9, %v1111_v34 }
 0xece   :  { %v1117_v41 = vmul.f32 1.442695, %v1115_v2 }
 0xed3   :  { %v1114_v43 = vpop.xlane.xlu2 %1113 }
 0xed4   :  { %v1116_v14 = vsub.f32 %v1107_v16, %v1114_v43 }
 0xed6   :  { %v1119_v32 = vmul.f32 1.442695, %v1116_v14 }
 0xed8   :  { %2014 = vpow2.f32 %v1119_v32 }
 0xed9   :  { %2016 = vpow2.f32 %v1117_v41  ;;  %v1846_v41 = vld [vmem:[%s2732_s8 + $0x18] sm:$0xf] }
 0xede   :  { %v2015_v31 = vpop.eup %2014 }
 0xedf   :  { %v1124_v15 = vsel %vm278_vm9, %v2015_v31, 0.0  ;;  %v2017_v49 = vpop.eup %2016 }
 0xee0   :  { %1125 = vadd.xlane.f32.xlu0 %v1124_v15  ;;  %v1121_v45 = vsel %vm278_vm9, %v2017_v49, 0.0 }
 0xeed   :  { %v2586_v33 = vpop.f32.mrf.mxu2 }
 0xeee   :  { %v1222_v44 = vpop.xlane.xlu0 %1221 }
 0xeef   :  { %v1226_v48 = vsub.f32 %v1216_v39, %v1222_v44 }
 0xef1   :  { %v1228_v35 = vmul.f32 1.442695, %v1226_v48 }
 0xef3   :  { %2018 = vpow2.f32 %v1228_v35 }
 0xef5   :  { %v2588_v25 = vpop.f32.mrf.mxu2 }
 0xef9   :  { %v2019_v50 = vpop.eup %2018 }
 0xefa   :  { %v1232_v51 = vsel %vm278_vm9, %v2019_v50, 0.0 }
 0xefd   :  { %v1307_v7 = vpop.f32.mrf.mxu2 }
 0xefe   :  { %v1308_v38 = vadd.f32 %v2054_v8, %v1307_v7 }
 0xf00   :  { %v1312_v40 = vsel %vm278_vm9, %v1308_v38, -inf }
 0xf01   :  { %1313 = vmax.xlane.f32.xlu1 %v1312_v40  ;;  %v1850_v40 = vld [vmem:[%s2732_s8 + $0x1c] sm:$0xf] }
 0xf02   :  { %v1362_v23 = vsel %vm396_vm10, %v1850_v40, 0  ;;  %v1950_v40 = vld [vmem:[%s2735_s11 + $0x1] ss:$0 sm:$0xff] }
 0xf05   :  { %v1309_v46 = vpop.f32.mrf.mxu2 }
 0xf06   :  { %v1310_v47 = vadd.f32 %v2055_v13, %v1309_v46 }
 0xf08   :  { %v1315_v37 = vsel %vm278_vm9, %v1310_v47, -inf }
 0xf09   :  { %1316 = vmax.xlane.f32.xlu2 %v1315_v37  ;;  %1224 = vmax.xlane.f32.xlu1 %v1223_v21 }
 0xf11   :  { %1122 = vadd.xlane.f32.xlu2 %v1121_v45 }
 0xf19   :  { %1233 = vadd.xlane.f32.xlu2 %v1232_v51 }
 0xf22   :  { %1133 = vrot.lane.b32.xlu1 %v2531_v29, %s2766_s27 }
 0xf53   :  { %v1126_v61 = vpop.xlane.xlu0 %1125 }
 0xf74   :  { %v1314_v36 = vpop.xlane.xlu1 %1313 }
 0xf75   :  { %v1318_v19 = vsub.f32 %v1308_v38, %v1314_v36 }
 0xf77   :  { %v1320_v52 = vmul.f32 1.442695, %v1318_v19 }
 0xf79   :  { %2020 = vpow2.f32 %v1320_v52  ;;  %v1948_v52 = vld [vmem:[%s2733_s9 + $0x1] ss:$0 sm:$0xff] }
 0xf7c   :  { %v1317_v53 = vpop.xlane.xlu2 %1316  ;;  %v1225_v54 = vpop.xlane.xlu1 %1224 }
 0xf7d   :  { %v1227_v55 = vsub.f32 %v1218_v42, %v1225_v54  ;;  %v1319_v0 = vsub.f32 %v1310_v47, %v1317_v53  ;;  %v1270_v42 = vsel %vm396_vm10, %v1846_v41, 0 }
 0xf7e   :  { %1279 = vmatpush.bf16.msra.mxu1 %v1270_v42 }
 0xf7f   :  { %v2021_v56 = vpop.eup %2020  ;;  %v1230_v57 = vmul.f32 1.442695, %v1227_v55  ;;  %v1322_v59 = vmul.f32 1.442695, %v1319_v0 }
 0xf80   :  { %v1324_v58 = vsel %vm278_vm9, %v2021_v56, 0.0 }
 0xf81   :  { %1325 = vadd.xlane.f32.xlu2 %v1324_v58  ;;  %2022 = vpow2.f32 %v1230_v57 }
 0xf82   :  { %2024 = vpow2.f32 %v1322_v59 }
 0xf84   :  { %v1123_v18 = vpop.xlane.xlu2 %1122 }
 0xf85   :  { %2026 = vrcp.f32 %v1123_v18 }
 0xf86   :  { %2028 = vrcp.f32 %v1126_v61 }
 0xf87   :  { %v2023_v27 = vpop.eup %2022 }
 0xf88   :  { %v1235_v63 = vsel %vm278_vm9, %v2023_v27, 0.0  ;;  %v2025_v1 = vpop.eup %2024 }
 0xf89   :  { %1236 = vadd.xlane.f32.xlu0 %v1235_v63  ;;  %v1327_v22 = vsel %vm278_vm9, %v2025_v1, 0.0 }
 0xf8b   :  { %v2027_v3 = vpop.eup %2026 }
 0xf8c   :  { %v2029_v4 = vpop.eup %2028  ;;  %v1129_v5 = vmul.f32 %v2027_v3, %v2017_v49  ;;  %v1234_v12 = vpop.xlane.xlu2 %1233 }
 0xf8d   :  { %v1130_v8 = vmul.f32 %v2029_v4, %v2015_v31 }
 0xf8f   :  { %v1131_v11 = vpack.c.bf16 %v1130_v8, %v1129_v5  ;;  %v1921_v8 = vld [vmem:[%s2736_s12 + $0x18] sm:$0xff] }
 0xf91   :  { %1328 = vadd.xlane.f32.xlu0 %v1327_v22 }
 0xf94   :  { %v1134_v9 = vpop.permute.xlu1 %1133 }
 0xf95   :  { %1146 = vmatpush.bf16.msrb.mxu0 %v1134_v9 }
 0xf98   :  { %1840 = vmatmul.msk.bf16.vlgmr.msrb.gmra.mxu0 %vm278_vm9, %v1131_v11 }
 0xf99   :  { %1335 = vrot.lane.b32.xlu2 %v2531_v29, %s2768_s1  ;;  %s1741_s1 = sshll.u32 %s2744_s20, 4  ;;  %s1742_s1 = int_to_ptr.hbm [resolvable:$true] %s1741_s1 }
 0xfa5   :  { %1243 = vrot.lane.b32.xlu0 %v2531_v29, %s2091_s30 }
 0xff4   :  { %v1326_v13 = vpop.xlane.xlu2 %1325 }
 0xff5   :  { %2030 = vrcp.f32 %v1326_v13 }
 0xffb   :  { %v2031_v26 = vpop.eup %2030 }
 0xffc   :  { %v1336_v16 = vpop.permute.xlu2 %1335  ;;  %v1237_v20 = vpop.xlane.xlu0 %1236  ;;  %v1332_v28 = vmul.f32 %v2031_v26, %v2021_v56 }
 0xffd   :  { %1348 = vmatpush.bf16.msrb.mxu3 %v1336_v16 }
0x1004   :  { %v1329_v24 = vpop.xlane.xlu0 %1328 }
0x1005   :  { %2032 = vrcp.f32 %v1329_v24 }
0x1006   :  { %2034 = vrcp.f32 %v1237_v20 }
0x1007   :  { %2036 = vrcp.f32 %v1234_v12  ;;  %v1920_v12 = vld [vmem:[%s2736_s12 + $0x10] sm:$0xff] }
0x100b   :  { %v2033_v39 = vpop.eup %2032 }
0x100c   :  { %v1333_v29 = vmul.f32 %v2033_v39, %v2025_v1  ;;  %v2035_v43 = vpop.eup %2034 }
0x100d   :  { %v2037_v14 = vpop.eup %2036  ;;  %v1241_v31 = vmul.f32 %v2035_v43, %v2023_v27 }
0x100e   :  { %v1334_v30 = vpack.c.bf16 %v1333_v29, %v1332_v28  ;;  %v1240_v15 = vmul.f32 %v2037_v14, %v2019_v50 }
0x1010   :  { %1849 = vmatmul.msk.bf16.vlgmr.msrb.gmra.mxu3 %vm278_vm9, %v1334_v30  ;;  %v1242_v7 = vpack.c.bf16 %v1241_v31, %v1240_v15 }
0x1015   :  { %v1148_v32 = vpop.f32.mrf.mxu0 }
0x1017   :  { %v1244_v34 = vpop.permute.xlu0 %1243 }
0x1018   :  { %1256 = vmatpush.bf16.msra.mxu0 %v1244_v34  ;;  %v1949_v34 = vld [vmem:[%s2734_s10 + $0x1] ss:$0 sm:$0xff] }
0x101b   :  { %1845 = vmatmul.msk.bf16.vlgmr.msra.gmra.mxu0 %vm278_vm9, %v1242_v7 }
0x101c   :  { %1371 = vmatpush.bf16.msrb.mxu0 %v1362_v23 }
0x101d   :  { %v1150_v38 = vpop.f32.mrf.mxu0 }
0x101e   :  { %v1153_v2 = vpack.c.bf16 %v1150_v38, %v1148_v32 }
0x1020   :  { %1842 = vmatmul.msk.bf16.vlgmr.msrb.gmra.mxu1 %vm257_vm8, %v1153_v2 }
0x1021   :  { %1479 = vmatpush.bf16.msrb.mxu1 %v1921_v8 }
0x1025   :  { %1480 = vmatpush.bf16.msrb.mxu1 %v1920_v12 }
0x1093   :  { %v1350_v44 = vpop.f32.mrf.mxu3 }
0x1098   :  { %v1258_v46 = vpop.f32.mrf.mxu0 }
0x109b   :  { %v1352_v47 = vpop.f32.mrf.mxu3 }
0x109c   :  { %v1355_v48 = vpack.c.bf16 %v1352_v47, %v1350_v44 }
0x109d   :  { %v1171_v35 = vpop.f32.mrf.mxu1 }
0x109e   :  { %1851 = vmatmul.msk.bf16.vlgmr.msrb.gmra.mxu0 %vm257_vm8, %v1355_v48  ;;  %v1192_v45 = vadd.f32 %v2586_v33, %v1171_v35  ;;  %v1951_v48 = vld [vmem:[%s2737_s13 + $0x1] ss:$0 sm:$0xff] }
0x10a0   :  { %v1260_v37 = vpop.f32.mrf.mxu0 }
0x10a1   :  { %v1263_v21 = vpack.c.bf16 %v1260_v37, %v1258_v46 }
0x10a3   :  { %1847 = vmatmul.msk.bf16.vlgmr.msra.gmra.mxu1 %vm257_vm8, %v1263_v21 }
0x10a5   :  { %v1173_v49 = vpop.f32.mrf.mxu1 }
0x10a6   :  { %v1194_v54 = vadd.f32 %v2588_v25, %v1173_v49 }
0x111b   :  { %v1373_v50 = vpop.f32.mrf.mxu0 }
0x1120   :  { %v1281_v51 = vpop.f32.mrf.mxu1 }
0x1121   :  { %v1286_v36 = vadd.f32 %v1281_v51, %v1192_v45 }
0x1123   :  { %v1378_v19 = vadd.f32 %v1373_v50, %v1286_v36  ;;  %v1375_v33 = vpop.f32.mrf.mxu0 }
0x1125   :  { %v1380_v53 = vadd.f32 %v1378_v19, %v2478_v60 }
0x1127   :  { %v2628_v55 = vadd.f32 %v1948_v52, %v1380_v53 }
0x1128   :  { %v1283_v56 = vpop.f32.mrf.mxu1 }
0x1129   :  { %v1287_v57 = vadd.f32 %v1283_v56, %v1194_v54  ;;  %v1393_v0 = vsel %vm77_vm0, %v2628_v55, 0.0 }
0x112a   :  { %1394 = vadd.xlane.f32.xlu1 %v1393_v0 }
0x112b   :  { %v1379_v58 = vadd.f32 %v1375_v33, %v1287_v57 }
0x112d   :  { %v1381_v59 = vadd.f32 %v1379_v58, %v2483_v62 }
0x112f   :  { %v2633_v18 = vadd.f32 %v1948_v52, %v1381_v59 }
0x1131   :  { %v1396_v27 = vsel %vm77_vm0, %v2633_v18, 0.0 }
0x1132   :  { %1397 = vadd.xlane.f32.xlu0 %v1396_v27  ;;  %v1925_v27 = vld [vmem:[%s2738_s14 + $0x38] sm:$0xff] }
0x1133   :  { %1621 = vmatpush.bf16.msrb.mxu2 %v1925_v27 }
0x119d   :  { %v1395_v60 = vpop.xlane.xlu1 %1394 }
0x119e   :  { %v1399_v25 = vmul.f32 %v1395_v60, %v2212_v10 }
0x11a0   :  { %v1401_v61 = vsub.f32 %v2628_v55, %v1399_v25 }
0x11a2   :  { %v1403_v63 = vmul.f32 %v1401_v61, %v1401_v61 }
0x11a4   :  { %v1405_v1 = vsel %vm77_vm0, %v1403_v63, 0.0 }
0x11a5   :  { %1406 = vadd.xlane.f32.xlu2 %v1405_v1  ;;  %v1398_v3 = vpop.xlane.xlu0 %1397 }
0x11a6   :  { %v1400_v4 = vmul.f32 %v1398_v3, %v2212_v10 }
0x11a8   :  { %v1402_v62 = vsub.f32 %v2633_v18, %v1400_v4 }
0x11aa   :  { %v1404_v22 = vmul.f32 %v1402_v62, %v1402_v62 }
0x11ac   :  { %v1408_v5 = vsel %vm77_vm0, %v1404_v22, 0.0 }
0x11ad   :  { %1409 = vadd.xlane.f32.xlu1 %v1408_v5 }
0x1218   :  { %v1407_v9 = vpop.xlane.xlu2 %1406 }
0x1219   :  { %v1411_v11 = vmul.f32 %v1407_v9, %v2212_v10 }
0x121b   :  { %v1413_v13 = vadd.f32 1e-05, %v1411_v11 }
0x121d   :  { %2038 = vrsqrt.f32 %v1413_v13  ;;  %vm1421_vm9 = vweird.f32 %v1413_v13 }
0x1220   :  { %v1410_v16 = vpop.xlane.xlu1 %1409 }
0x1221   :  { %v1412_v17 = vmul.f32 %v1410_v16, %v2212_v10  ;;  %v1923_v16 = vld [vmem:[%s2738_s14 + $0x28] sm:$0xff] }
0x1223   :  { %v2039_v20 = vpop.eup %2038  ;;  %v1414_v6 = vadd.f32 1e-05, %v1412_v17 }
0x1224   :  { %v1416_v24 = vmul.f32 %v2039_v20, %v1413_v13  ;;  %vm1422_vm8 = vweird.f32 %v2039_v20 }
0x1225   :  { %2040 = vrsqrt.f32 %v1414_v6  ;;  %vm1423_vm10 = vmor %vm1421_vm9, %vm1422_vm8  ;;  %vm1431_vm6 = vweird.f32 %v1414_v6 }
0x1226   :  { %v1417_v26 = vmul.f32 %v2039_v20, %v1416_v24 }
0x1228   :  { %v1418_v39 = vmul.f32 0.5, %v1417_v26 }
0x122a   :  { %v1419_v28 = vsub.f32 1.5, %v1418_v39  ;;  %v1922_v39 = vld [vmem:[%s2738_s14 + $0x20] sm:$0xff] }
0x122b   :  { %v2041_v29 = vpop.eup %2040 }
0x122c   :  { %v1420_v30 = vmul.f32 %v2039_v20, %v1419_v28  ;;  %v1426_v43 = vmul.f32 %v2041_v29, %v1414_v6  ;;  %vm1432_vm5 = vweird.f32 %v2041_v29 }
0x122d   :  { %vm1433_vm7 = vmor %vm1431_vm6, %vm1432_vm5 }
0x122e   :  { %v1427_v14 = vmul.f32 %v2041_v29, %v1426_v43  ;;  %v1424_v32 = vsel %vm1423_vm10, %v2039_v20, %v1420_v30 }
0x122f   :  { %v1435_v7 = vmul.f32 %v1424_v32, %v1401_v61 }
0x1230   :  { %v1428_v31 = vmul.f32 0.5, %v1427_v14 }
0x1231   :  { %v1440_v23 = vmul.f32 %v1949_v34, %v1435_v7 }
0x1232   :  { %v1429_v15 = vsub.f32 1.5, %v1428_v31 }
0x1233   :  { %v1445_v44 = vadd.f32 %v1950_v40, %v1440_v23 }
0x1234   :  { %v1430_v38 = vmul.f32 %v2041_v29, %v1429_v15 }
0x1236   :  { %v1434_v2 = vsel %vm1433_vm7, %v2041_v29, %v1430_v38  ;;  %vm1692_vm7 = vcmask 1040384  }
0x1237   :  { %v1436_v41 = vmul.f32 %v1434_v2, %v1402_v62  ;;  %v1924_v62 = vld [vmem:[%s2738_s14 + $0x30] sm:$0xff] }
0x1238   :  { %1622 = vmatpush.bf16.msrb.mxu2 %v1924_v62 }
0x1239   :  { %v1441_v42 = vmul.f32 %v1949_v34, %v1436_v41 }
0x123b   :  { %v1446_v46 = vadd.f32 %v1950_v40, %v1441_v42 }
0x123c   :  { %1623 = vmatpush.bf16.msrb.mxu2 %v1923_v16 }
0x123d   :  { %v1454_v47 = vpack.c.bf16 %v1446_v46, %v1445_v44 }
0x123f   :  { %1868 = vmatmul.msk.bf16.vlgmr.msrb.gmra.mxu1 %vm77_vm0, %v1454_v47 }
0x1240   :  { %1624 = vmatpush.bf16.msrb.mxu2 %v1922_v39 }
0x12bc   :  { %v1482_v37 = vpop.f32.mrf.mxu1 }
0x12bd   :  { %v2661_v21 = vadd.f32 %v1951_v48, %v1482_v37 }
0x12bf   :  { %v2664_v35 = vmul.f32 0.70710677, %v2661_v21 }
0x12c1   :  { %v1491_v49 = vmul.f32 %v2664_v35, %v2664_v35 }
0x12c3   :  { %v1492_v45 = vmin.f32 %v1491_v49, 16.0 }
0x12c4   :  { %v1484_v50 = vpop.f32.mrf.mxu1 }
0x12c5   :  { %v1493_v51 = vmul.f32 2.1237322e-06, %v1492_v45  ;;  %v1504_v36 = vmul.f32 3.8918573e-05, %v1492_v45  ;;  %v2668_v19 = vadd.f32 %v1951_v48, %v1484_v50 }
0x12c7   :  { %v1494_v52 = vadd.f32 0.00028619796, %v1493_v51  ;;  %v1505_v53 = vadd.f32 0.001143296, %v1504_v36  ;;  %v2671_v54 = vmul.f32 0.70710677, %v2668_v19 }
0x12c9   :  { %v1506_v56 = vmul.f32 %v1505_v53, %v1492_v45  ;;  %v1531_v57 = vmul.f32 %v2671_v54, %v2671_v54  ;;  %v1495_v0 = vmul.f32 %v1494_v52, %v1492_v45 }
0x12cb   :  { %v1507_v33 = vadd.f32 0.014752088, %v1506_v56  ;;  %v1532_v58 = vmin.f32 %v1531_v57, 16.0  ;;  %v1496_v61 = vadd.f32 0.0036580483, %v1495_v0 }
0x12cd   :  { %v1508_v59 = vmul.f32 %v1507_v33, %v1492_v45  ;;  %v1533_v60 = vmul.f32 2.1237322e-06, %v1532_v58  ;;  %v1544_v25 = vmul.f32 3.8918573e-05, %v1532_v58  ;;  %v1497_v8 = vmul.f32 %v1496_v61, %v1492_v45 }
0x12cf   :  { %v1509_v63 = vadd.f32 0.112945676, %v1508_v59  ;;  %v1534_v1 = vadd.f32 0.00028619796, %v1533_v60  ;;  %v1545_v3 = vadd.f32 0.001143296, %v1544_v25 }
0x12d0   :  { %v1498_v20 = vadd.f32 0.05243302, %v1497_v8 }
0x12d1   :  { %v1510_v4 = vmul.f32 %v1509_v63, %v1492_v45  ;;  %v1535_v22 = vmul.f32 %v1534_v1, %v1532_v58  ;;  %v1546_v5 = vmul.f32 %v1545_v3, %v1532_v58  ;;  %v1487_v1 = vmul.f32 0.5, %v2661_v21 }
0x12d2   :  { %v1499_v29 = vmul.f32 %v1498_v20, %v1492_v45  ;;  %v1488_v3 = vmul.f32 0.5, %v2668_v19 }
0x12d3   :  { %v1511_v9 = vadd.f32 0.4994258, %v1510_v4  ;;  %v1536_v11 = vadd.f32 0.0036580483, %v1535_v22  ;;  %v1547_v12 = vadd.f32 0.014752088, %v1546_v5 }
0x12d4   :  { %v1500_v31 = vadd.f32 0.18741608, %v1499_v29 }
0x12d5   :  { %v1512_v13 = vmul.f32 %v1511_v9, %v1492_v45  ;;  %v1548_v17 = vmul.f32 %v1547_v12, %v1532_v58  ;;  %v1537_v24 = vmul.f32 %v1536_v11, %v1532_v58 }
0x12d6   :  { %v1501_v2 = vmul.f32 %v1500_v31, %v1492_v45  ;;  %v1926_v31 = vld [vmem:[%s2742_s18] sm:$0xff] }
0x12d7   :  { %v1513_v6 = vadd.f32 1.0, %v1512_v13  ;;  %v1549_v26 = vadd.f32 0.112945676, %v1548_v17  ;;  %v1538_v30 = vadd.f32 0.05243302, %v1537_v24 }
0x12d8   :  { %v1502_v46 = vadd.f32 1.1283791, %v1501_v2 }
0x12d9   :  { %2042 = vrcp.f32 %v1513_v6  ;;  %v1550_v28 = vmul.f32 %v1549_v26, %v1532_v58  ;;  %v1539_v34 = vmul.f32 %v1538_v30, %v1532_v58  ;;  %v1525_v23 = vand.u32 2147483648, %v1513_v6 }
0x12da   :  { %v1523_v42 = vand.u32 2147483647, %v1513_v6  ;;  %vm1519_vm12 = vweird.f32 %v1513_v6  ;;  %v1503_v36 = vmul.f32 %v1502_v46, %v2664_v35 }
0x12db   :  { %v1551_v43 = vadd.f32 0.4994258, %v1550_v28  ;;  %v1540_v41 = vadd.f32 0.18741608, %v1539_v34  ;;  %v1526_v37 = vor.u32 1.1754944e-38, %v1525_v23 }
0x12dc   :  { %vm1524_vm15 = vcmp.eq.f32.partialorder %v1523_v42, 8.507059e+37 }
0x12dd   :  { %v1552_v14 = vmul.f32 %v1551_v43, %v1532_v58  ;;  %v1541_v49 = vmul.f32 %v1540_v41, %v1532_v58  ;;  %v1927_v43 = vld [vmem:[%s2742_s18 + $0x8] sm:$0xff] }
0x12de   :  { %1724 = vmatpush.bf16.msra.mxu3 %v1927_v43 }
0x12df   :  { %v2043_v32 = vpop.eup %2042  ;;  %v1553_v7 = vadd.f32 1.0, %v1552_v14  ;;  %v1542_v45 = vadd.f32 1.1283791, %v1541_v49 }
0x12e0   :  { %v1515_v15 = vmul.f32 %v2043_v32, %v1513_v6  ;;  %vm1520_vm11 = vweird.f32 %v2043_v32 }
0x12e1   :  { %2044 = vrcp.f32 %v1553_v7  ;;  %vm1521_vm14 = vmor %vm1519_vm12, %vm1520_vm11  ;;  %v1565_v53 = vand.u32 2147483648, %v1553_v7  ;;  %v1563_v0 = vand.u32 2147483647, %v1553_v7  ;;  %vm1559_vm2 = vweird.f32 %v1553_v7 }
0x12e2   :  { %v1516_v38 = vsub.f32 1.0, %v1515_v15  ;;  %v1543_v60 = vmul.f32 %v1542_v45, %v2671_v54  ;;  %v1952_v54 = vld [vmem:[%s2739_s15 + $0x1] ss:$0 sm:$0xff]  ;;  %1725 = vmatpush.bf16.msra.mxu3 %v1926_v31  ;;  %vm1732_vm11 = vcmask 254976  }
0x12e3   :  { %v1566_v59 = vor.u32 1.1754944e-38, %v1565_v53  ;;  %vm1564_vm4 = vcmp.eq.f32.partialorder %v1563_v0, 8.507059e+37 }
0x12e4   :  { %v1517_v40 = vmul.f32 %v2043_v32, %v1516_v38 }
0x12e6   :  { %v1518_v44 = vadd.f32 %v2043_v32, %v1517_v40 }
0x12e7   :  { %v2045_v47 = vpop.eup %2044 }
0x12e8   :  { %v1522_v48 = vsel %vm1521_vm14, %v2043_v32, %v1518_v44  ;;  %v1555_v50 = vmul.f32 %v2045_v47, %v1553_v7  ;;  %vm1560_vm1 = vweird.f32 %v2045_v47 }
0x12e9   :  { %v1527_v51 = vsel %vm1524_vm15, %v1526_v37, %v1522_v48  ;;  %vm1561_vm3 = vmor %vm1559_vm2, %vm1560_vm1  ;;  %v1953_v37 = vld [vmem:[%s2740_s16] ss:$0 sm:$0xff] }
0x12ea   :  { %v1556_v52 = vsub.f32 1.0, %v1555_v50  ;;  %v1528_v56 = vmul.f32 %v1527_v51, %v1503_v36  ;;  %v1954_v51 = vld [vmem:[%s2741_s17] ss:$0 sm:$0xff]  ;;  %s2092_s17 = smov [#allocation2]  }
0x12eb   :  { %s1739_s27 = sshll.u32 %s2092_s17, 4  ;;  %s1740_s27 = int_to_ptr.vmem [resolvable:$true] %s1739_s27 }
0x12ec   :  { %v1557_v57 = vmul.f32 %v2045_v47, %v1556_v52  ;;  %v1869_v27 = vclamps-f32 %v1528_v56, 1.0 }
0x12ee   :  { %v1558_v33 = vadd.f32 %v2045_v47, %v1557_v57  ;;  %v1571_v63 = vadd.f32 1.0, %v1869_v27 }
0x12f0   :  { %v1562_v58 = vsel %vm1561_vm3, %v2045_v47, %v1558_v33  ;;  %v1573_v62 = vmul.f32 %v1571_v63, %v1487_v1 }
0x12f1   :  { %v1567_v25 = vsel %vm1564_vm4, %v1566_v59, %v1562_v58 }
0x12f2   :  { %v1568_v61 = vmul.f32 %v1567_v25, %v1543_v60  ;;  %v1955_v60 = vld [vmem:[%s2743_s19] ss:$0 sm:$0xff] }
0x12f4   :  { %v1870_v35 = vclamps-f32 %v1568_v61, 1.0 }
0x12f6   :  { %v1572_v4 = vadd.f32 1.0, %v1870_v35 }
0x12f8   :  { %v1574_v22 = vmul.f32 %v1572_v4, %v1488_v3 }
0x12fa   :  { %v1586_v5 = vpack.c.bf16 %v1574_v22, %v1573_v62 }
0x12fc   :  { %1896 = vmatmul.msk.bf16.vlgmr.msrb.gmra.mxu2 %vm845_vm13, %v1586_v5 }
0x137f   :  { %v1626_v8 = vpop.f32.mrf.mxu2 }
0x1380   :  { %v1627_v13 = vadd.f32 %v1952_v54, %v1626_v8 }
0x1382   :  { %v1631_v19 = vadd.f32 %v1627_v13, %v2628_v55 }
0x1384   :  { %v1635_v16 = vsel %vm77_vm0, %v1631_v19, 0.0 }
0x1387   :  { %v1628_v9 = vpop.f32.mrf.mxu2 }
0x1388   :  { %v1629_v11 = vadd.f32 %v1952_v54, %v1628_v9 }
0x138a   :  { %v1632_v12 = vadd.f32 %v1629_v11, %v2633_v18 }
0x138c   :  { %v1638_v21 = vsel %vm77_vm0, %v1632_v12, 0.0 }
0x138d   :  { %1639 = vadd.xlane.f32.xlu1 %v1638_v21 }
0x1395   :  { %1636 = vadd.xlane.f32.xlu1 %v1635_v16 }
0x1400   :  { %v1640_v17 = vpop.xlane.xlu1 %1639 }
0x1401   :  { %v1642_v20 = vmul.f32 %v1640_v17, %v2212_v10 }
0x1403   :  { %v1644_v6 = vsub.f32 %v1632_v12, %v1642_v20 }
0x1405   :  { %v1646_v24 = vmul.f32 %v1644_v6, %v1644_v6 }
0x1407   :  { %v1650_v26 = vsel %vm77_vm0, %v1646_v24, 0.0 }
0x1408   :  { %1651 = vadd.xlane.f32.xlu0 %v1650_v26  ;;  %v1637_v39 = vpop.xlane.xlu1 %1636 }
0x1409   :  { %v1641_v18 = vmul.f32 %v1637_v39, %v2212_v10 }
0x140b   :  { %v1643_v28 = vsub.f32 %v1631_v19, %v1641_v18 }
0x140d   :  { %v1645_v29 = vmul.f32 %v1643_v28, %v1643_v28 }
0x140f   :  { %v1647_v30 = vsel %vm77_vm0, %v1645_v29, 0.0 }
0x1410   :  { %1648 = vadd.xlane.f32.xlu2 %v1647_v30 }
0x147b   :  { %v1652_v55 = vpop.xlane.xlu0 %1651 }
0x147c   :  { %v1654_v14 = vmul.f32 %v1652_v55, %v2212_v10 }
0x147e   :  { %v1656_v32 = vadd.f32 1e-05, %v1654_v14 }
0x1480   :  { %2046 = vrsqrt.f32 %v1656_v32  ;;  %vm1673_vm8 = vweird.f32 %v1656_v32 }
0x1483   :  { %v1649_v15 = vpop.xlane.xlu2 %1648 }
0x1484   :  { %v1653_v34 = vmul.f32 %v1649_v15, %v2212_v10 }
0x1486   :  { %v2047_v7 = vpop.eup %2046  ;;  %v1655_v38 = vadd.f32 1e-05, %v1653_v34 }
0x1487   :  { %v1668_v2 = vmul.f32 %v2047_v7, %v1656_v32  ;;  %vm1674_vm13 = vweird.f32 %v2047_v7 }
0x1488   :  { %2048 = vrsqrt.f32 %v1655_v38  ;;  %vm1675_vm9 = vmor %vm1673_vm8, %vm1674_vm13  ;;  %vm1663_vm5 = vweird.f32 %v1655_v38 }
0x1489   :  { %v1669_v40 = vmul.f32 %v2047_v7, %v1668_v2 }
0x148b   :  { %v1670_v23 = vmul.f32 0.5, %v1669_v40 }
0x148d   :  { %v1671_v41 = vsub.f32 1.5, %v1670_v23 }
0x148e   :  { %v2049_v42 = vpop.eup %2048 }
0x148f   :  { %v1672_v44 = vmul.f32 %v2047_v7, %v1671_v41  ;;  %v1658_v46 = vmul.f32 %v2049_v42, %v1655_v38  ;;  %vm1664_vm10 = vweird.f32 %v2049_v42 }
0x1490   :  { %vm1665_vm6 = vmor %vm1663_vm5, %vm1664_vm10 }
0x1491   :  { %v1676_v47 = vsel %vm1675_vm9, %v2047_v7, %v1672_v44  ;;  %v1659_v48 = vmul.f32 %v2049_v42, %v1658_v46 }
0x1492   :  { %v1678_v10 = vmul.f32 %v1676_v47, %v1644_v6 }
0x1493   :  { %v1660_v49 = vmul.f32 0.5, %v1659_v48 }
0x1494   :  { %v1683_v36 = vmul.f32 %v1953_v37, %v1678_v10 }
0x1495   :  { %v1661_v50 = vsub.f32 1.5, %v1660_v49 }
0x1496   :  { %v1688_v53 = vadd.f32 %v1954_v51, %v1683_v36 }
0x1497   :  { %v1662_v52 = vmul.f32 %v2049_v42, %v1661_v50 }
0x1498   :  { %v1690_v0 = vrot.slane %v1688_v53, 7 }
0x1499   :  { %v1666_v45 = vsel %vm1665_vm6, %v2049_v42, %v1662_v52 }
0x149a   :  { %v1677_v56 = vmul.f32 %v1666_v45, %v1643_v28 }
0x149c   :  { %v1682_v57 = vmul.f32 %v1953_v37, %v1677_v56 }
0x149e   :  { %v1687_v33 = vadd.f32 %v1954_v51, %v1682_v57 }
0x14a0   :  { %v1693_v59 = vsel %vm1692_vm7, %v1687_v33, %v1690_v0 }
0x14a1   :  { %v1699_v27 = vpack.c.bf16 %v1693_v59, %v1693_v59 }
0x14a3   :  { %1905 = vmatmul.msk.bf16.vlgmr.msra.gmra.mxu3 %vm77_vm0, %v1699_v27 }
0x1526   :  { %v1727_v58 = vpop.f32.mrf.mxu3 }
0x1527   :  { %v1728_v25 = vadd.f32 %v1955_v60, %v1727_v58 }
0x1529   :  { %2050 = vtanh.f32 %v1728_v25 }
0x152e   :  { %v1729_v61 = vpop.f32.mrf.mxu3 }
0x152f   :  { %v2051_v63 = vpop.eup %2050 }
0x1530   :  { %1733 = vst.msk [vmem:[#allocation2] sm:$0x3] %vm1732_vm11, %v2051_v63 }
0x1531   :  { %1744 = dma.vmem_to_hbm [thread:$0]  %s1740_s27, 32, %s1742_s1, [#allocation3]  }
0x1532   :  { %2080 = dma.done.wait [#allocation3], 32  }
0x1533   :  { %2081 = vsyncadd [#allocation3], 4294967264 }
0x1534   :  { %1749 = vsyncpa [#allocation3], 1 }

</bundles_post_ra>
